<compile_context>
chip_gen: v7x
topology: tpu7x:2x2x1
jax: 0.10.0
libtpu: 0.0.40
codegen_flags: <defaults>
</compile_context>

<pallas_src>
import functools

import jax
import jax.numpy as jnp
from jax.experimental import pallas as pl
from jax.experimental.pallas import tpu as pltpu

NEG_SLOPE = 0.01          # torch.nn.functional.leaky_relu default
CIN_PAD = 8               # nf + nc padded to one sublane group (NOT 128 lanes)
H0_PAD = 128              # first hidden width (nc channels) padded to one lane group
_MIB = 1024 * 1024


def _leaky(v):
    # max-form leaky_relu: 2 VPU ops/elem (mul+max) instead of 3 (cmp+select+mul).
    return jnp.maximum(v, NEG_SLOPE * v)


# --------------------------------------------------------------------------------------
# Hardware / feature probes (cached, run once)
# --------------------------------------------------------------------------------------
@functools.lru_cache(maxsize=None)
def _vmem_capacity_bytes():
    """Physical VMEM of the attached TPU; conservative (v7x, 64 MiB) if unknown."""
    try:
        cap = getattr(pltpu.get_tpu_info(), "vmem_capacity_bytes", None)
        if cap:
            return int(cap)
    except Exception:
        pass
    return 64 * _MIB


@functools.lru_cache(maxsize=None)
def _single_buffer_ok():
    """Probe pipeline_mode=pl.Buffered(1) support with a tiny copy kernel, so the
    main kernels always compile even if this JAX build rejects buffer_count=1."""
    def _k(x_ref, o_ref):
        o_ref[...] = x_ref[...] + 1.0
    try:
        f = pl.pallas_call(
            _k,
            out_shape=jax.ShapeDtypeStruct((8, 128), jnp.float32),
            grid=(2,),
            in_specs=[pl.BlockSpec((8, 128), lambda i: (0, 0),
                                   pipeline_mode=pl.Buffered(1))],
            out_specs=pl.BlockSpec((8, 128), lambda i: (0, 0)),
        )
        jax.block_until_ready(f(jnp.zeros((8, 128), jnp.float32)))
        return True
    except Exception:
        return False


def _resident_spec(shape):
    """Full-array block with a constant index_map: fetched once, VMEM-resident.
    Single-buffered when supported (a second pipeline buffer on a never-refetched
    block is pure VMEM waste -- matters most on v7x's 64 MiB)."""
    zeros = (0,) * len(shape)
    kwargs = {}
    if _single_buffer_ok():
        kwargs["pipeline_mode"] = pl.Buffered(1)
    return pl.BlockSpec(tuple(shape), lambda i: zeros, **kwargs)


# --------------------------------------------------------------------------------------
# Kernel bodies
# --------------------------------------------------------------------------------------
def _conv_chain(xc_ref, w0_ref, w1_ref, w2_ref, w3_ref, w4_ref, cb_ref):
    """leaky(conv00(x)+conv01(cond)) -> conv1..conv3 (leaky) -> conv4 -> max(samples).

    xc_ref : (tg, W, CIN_PAD) bf16, W a multiple of 16 so the (tg,W)->rows merge and
             rows->(tg,W) split below are tile-aligned free views.
    cb_ref : (8, L) bf16 packed biases (row 0: fused conv00/01, rows 1..4: conv1..4).
    Returns the per-group max-pooled features, (tg, L) bf16.
    """
    tg, W, cin = xc_ref.shape
    L = w4_ref.shape[-1]
    h = xc_ref[...].reshape(tg * W, cin)                     # free view (W % 16 == 0)

    def layer(a, w_ref, row, width, act):
        acc = jnp.dot(a, w_ref[...], preferred_element_type=jnp.float32)
        # bf16 epilogue (bias + leaky): native bf16 VALU on v6e/v7x => 2x packed ops.
        acc = acc.astype(jnp.bfloat16) + cb_ref[row:row + 1, :width]
        return _leaky(acc) if act else acc

    h = layer(h, w0_ref, 0, H0_PAD, True)    # fused conv00(x) + conv01(cond)
    h = layer(h, w1_ref, 1, 256, True)       # conv1
    h = layer(h, w2_ref, 2, 256, True)       # conv2
    h = layer(h, w3_ref, 3, L, True)         # conv3
    h = layer(h, w4_ref, 4, L, False)        # conv4: no activation, kept bf16

    # torch.max(x, 3): reduce over the sample axis, in bf16 (half the vld/vst bytes).
    return jnp.max(h.reshape(tg, W, L), axis=1)


def _lin_chain(h, wl1_ref, wl2_ref, wl3_ref, lb_ref):
    """lin1 -> lin2 (leaky) -> lin3 on bf16 rows; returns f32 (final output dtype)."""
    def mm(a, w_ref):
        return jnp.dot(a, w_ref[...], preferred_element_type=jnp.float32)

    h = _leaky(mm(h, wl1_ref) + lb_ref[0:1, :]).astype(jnp.bfloat16)
    h = _leaky(mm(h, wl2_ref) + lb_ref[1:2, :]).astype(jnp.bfloat16)
    return mm(h, wl3_ref) + lb_ref[2:3, :]


def _conv_stage_kernel(xc_ref, w0, w1, w2, w3, w4, cb_ref, out_ref):
    out_ref[...] = _conv_chain(xc_ref, w0, w1, w2, w3, w4, cb_ref).astype(out_ref.dtype)


def _lin_stage_kernel(g_ref, wl1, wl2, wl3, lb_ref, out_ref):
    out_ref[...] = _lin_chain(g_ref[...], wl1, wl2, wl3, lb_ref).astype(out_ref.dtype)


def _fused_kernel(xc_ref, w0, w1, w2, w3, w4, wl1, wl2, wl3, cb_ref, lb_ref, out_ref):
    pooled = _conv_chain(xc_ref, w0, w1, w2, w3, w4, cb_ref)
    out_ref[...] = _lin_chain(pooled, wl1, wl2, wl3, lb_ref).astype(out_ref.dtype)


# --------------------------------------------------------------------------------------
# Tiling heuristics (cliff-free: grid always divides exactly via group padding)
# --------------------------------------------------------------------------------------
def _pick_group_tile(G, W, quantum, target_rows=1024, max_rows=2048):
    """Pick (tg, Gp): group tile (multiple of `quantum`) and padded group count.

    Preferences, in order: >= 2 grid steps (so v7x's 2 TensorCores both get work),
    an even step count, minimal group padding, MXU row-fill near target_rows.
    tg*W never exceeds max_rows except in the degenerate case W > max_rows/quantum,
    where it falls back to the smallest possible tile (quantum groups)."""
    cap = max(quantum, (max_rows // max(W, 1)) // quantum * quantum)
    cands = range(quantum, cap + 1, quantum)

    def score(t):
        Gp = ((G + t - 1) // t) * t
        steps = Gp // t
        return (0 if steps >= 2 else 1,
                0 if steps % 2 == 0 else 1,
                Gp - G,
                abs(t * W - target_rows),
                -t)

    tg = min(cands, key=score)
    Gp = ((G + tg - 1) // tg) * tg
    return tg, Gp


def _pick_row_tile(Gp, quantum=16, cap=1024):
    """Row tile for the lin stage: a divisor of Gp (multiple of `quantum`), as large
    as possible up to `cap`, preferring >= 2 and even grid step counts (v7x)."""
    cands = [t for t in range(quantum, min(Gp, cap) + 1, quantum) if Gp % t == 0]
    if not cands:
        return Gp

    def score(t):
        steps = Gp // t
        return (0 if steps >= 2 else 1, 0 if steps % 2 == 0 else 1, -t)

    return min(cands, key=score)


# --------------------------------------------------------------------------------------
# One-time parameter packing (hoisted out of the per-call forward)
# --------------------------------------------------------------------------------------
def pack_params(params, *, nf, nc, nlatent):
    """Pack PyTorch-style params into kernel-ready arrays (call once, outside jit):
    conv00/conv01 fused into one (8 -> 128) weight, all matmul weights bf16, conv
    biases packed into one (8, L) bf16 array, lin biases into one (8, L) f32 array."""
    L = nlatent
    p = params
    # TODO(synk): if nf + nc ever exceeds 8, bump CIN_PAD to the next sublane multiple
    # and re-derive the first-layer padding.
    assert nf + nc <= CIN_PAD, (nf, nc)
    assert L >= 256 and L % 128 == 0, L

    w0 = jnp.concatenate([p["w00"], p["w01"]], axis=0)                 # (nf+nc, nc)
    w0 = jnp.pad(w0, ((0, CIN_PAD - (nf + nc)), (0, H0_PAD - nc)))     # (8, 128)
    w1 = jnp.pad(p["w1"], ((0, H0_PAD - nc), (0, 0)))                  # (128, 256)
    conv_w = tuple(w.astype(jnp.bfloat16)
                   for w in (w0, w1, p["w2"], p["w3"], p["w4"]))
    lin_w = tuple(p[k].astype(jnp.bfloat16) for k in ("wl1", "wl2", "wl3"))

    cb = jnp.zeros((8, L), jnp.float32)
    cb = cb.at[0, :nc].set(p["b00"] + p["b01"])        # fused conv00+conv01 bias
    cb = cb.at[1, :256].set(p["b1"])
    cb = cb.at[2, :256].set(p["b2"])
    cb = cb.at[3, :].set(p["b3"])
    cb = cb.at[4, :].set(p["b4"])
    lb = jnp.zeros((8, L), jnp.float32)
    lb = lb.at[0, :].set(p["bl1"])
    lb = lb.at[1, :].set(p["bl2"])
    lb = lb.at[2, :].set(p["bl3"])

    return dict(conv_w=conv_w, lin_w=lin_w,
                conv_b=cb.astype(jnp.bfloat16), lin_b=lb)


# --------------------------------------------------------------------------------------
# Forward wrapper
# --------------------------------------------------------------------------------------
def pointnet_forward(x, cond, packed, *, nlatent, force_split=None):
    """x: (B, nf, nfps, nsample), cond: (B, nc, nfps, nsample) -> (B, nlatent, nfps)."""
    B, nf, H, W0 = x.shape
    _, nc, _, _ = cond.shape
    assert nf + nc <= CIN_PAD
    G, L = B * H, nlatent

    conv_w, lin_w = packed["conv_w"], packed["lin_w"]
    cb, lb = packed["conv_b"], packed["lin_b"]

    # ---- generation-aware budgets (v5e/v6e: 128 MiB VMEM, v7x: 64 MiB) ----
    cap = _vmem_capacity_bytes()
    vmem_limit = min(48 * _MIB, int(0.6 * cap))
    max_rows = 4096 if cap >= 96 * _MIB else 2048

    # ---- inputs: NCHW -> (group, sample, channel); concat x/cond; pad channels ----
    # TODO(synk): the (G, W, 8) input slab is lane-sparse (8/128 lanes); a lane-dense
    # layout would cut input DMA bytes ~16x but needs an in-kernel relayout -- minor
    # while the kernel is MXU-bound at these hidden widths.
    def to_gsc(a):
        return jnp.transpose(a, (0, 2, 3, 1)).reshape(G, W0, a.shape[1])

    xc = jnp.concatenate([to_gsc(x), to_gsc(cond)], axis=-1)            # (G, W0, nf+nc)
    xc = jnp.pad(xc, ((0, 0), (0, 0), (0, CIN_PAD - (nf + nc))))
    # Pad the sample axis to a multiple of 16 (bf16 sublane quantum) by replicating
    # existing samples: keeps in-kernel reshapes aligned views, leaves max() unchanged.
    W = ((W0 + 15) // 16) * 16
    if W != W0:
        xc = jnp.pad(xc, ((0, 0), (0, W - W0), (0, 0)), mode="edge")
    xc = xc.astype(jnp.bfloat16)

    # Small G: fuse lin1..lin3 into the conv kernel (one launch, no pooled HBM trip).
    fuse = (G <= 512) if force_split is None else (not force_split)
    quantum = 8 if fuse else 16            # bf16 pooled output blocks want 16-row tiles
    tg, Gp = _pick_group_tile(G, W, quantum, target_rows=1024, max_rows=max_rows)
    if Gp != G:                            # pad groups so the grid divides exactly
        xc = jnp.pad(xc, ((0, Gp - G), (0, 0), (0, 0)))

    conv_flops = 2 * Gp * W * (CIN_PAD * H0_PAD + H0_PAD * 256 + 256 * 256
                               + 256 * L + L * L)
    lin_flops = 2 * Gp * 3 * L * L
    conv_wbytes = 2 * sum(int(w.size) for w in conv_w) + 2 * int(cb.size)
    lin_wbytes = 2 * sum(int(w.size) for w in lin_w) + 4 * int(lb.size)
    in_bytes = 2 * Gp * W * CIN_PAD

    cparams = pltpu.CompilerParams(dimension_semantics=("parallel",),
                                   vmem_limit_bytes=vmem_limit)

    if fuse:
        out = pl.pallas_call(
            _fused_kernel,
            out_shape=jax.ShapeDtypeStruct((Gp, L), jnp.float32),
            grid=(Gp // tg,),
            in_specs=[pl.BlockSpec((tg, W, CIN_PAD), lambda i: (i, 0, 0))]
                     + [_resident_spec(w.shape) for w in conv_w]
                     + [_resident_spec(w.shape) for w in lin_w]
                     + [_resident_spec(cb.shape), _resident_spec(lb.shape)],
            out_specs=pl.BlockSpec((tg, L), lambda i: (i, 0)),
            compiler_params=cparams,
            cost_estimate=pl.CostEstimate(
                flops=conv_flops + lin_flops, transcendentals=0,
                bytes_accessed=in_bytes + conv_wbytes + lin_wbytes + 4 * Gp * L),
        )(xc, *conv_w, *lin_w, cb, lb)
    else:
        # Phase 1: per-point conv stack + max over samples.
        pooled = pl.pallas_call(
            _conv_stage_kernel,
            out_shape=jax.ShapeDtypeStruct((Gp, L), jnp.bfloat16),
            grid=(Gp // tg,),
            in_specs=[pl.BlockSpec((tg, W, CIN_PAD), lambda i: (i, 0, 0))]
                     + [_resident_spec(w.shape) for w in conv_w]
                     + [_resident_spec(cb.shape)],
            out_specs=pl.BlockSpec((tg, L), lambda i: (i, 0)),
            compiler_params=cparams,
            cost_estimate=pl.CostEstimate(
                flops=conv_flops, transcendentals=0,
                bytes_accessed=in_bytes + conv_wbytes + 2 * Gp * L),
        )(xc, *conv_w, cb)

        # Phase 2: lin1..lin3 over all groups in large row tiles (full MXU fill).
        tm = _pick_row_tile(Gp, quantum=16, cap=1024)
        out = pl.pallas_call(
            _lin_stage_kernel,
            out_shape=jax.ShapeDtypeStruct((Gp, L), jnp.float32),
            grid=(Gp // tm,),
            in_specs=[pl.BlockSpec((tm, L), lambda i: (i, 0))]
                     + [_resident_spec(w.shape) for w in lin_w]
                     + [_resident_spec(lb.shape)],
            out_specs=pl.BlockSpec((tm, L), lambda i: (i, 0)),
            compiler_params=cparams,
            cost_estimate=pl.CostEstimate(
                flops=lin_flops, transcendentals=0,
                bytes_accessed=2 * Gp * L + lin_wbytes + 4 * Gp * L),
        )(pooled, *lin_w, lb)

    # Drop padded groups; (B*nfps, nlatent) -> (B, nlatent, nfps) (PyTorch convention).
    return jnp.transpose(out[:G].reshape(B, H, L), (0, 2, 1))


# --------------------------------------------------------------------------------------
# Synthetic params + pure-JAX reference (f32)
# --------------------------------------------------------------------------------------
def init_params(key, nf=3, nc=3, nlatent=256):
    """Deterministic synthetic params.  Weights stored as (C_in, C_out)."""
    shapes = {
        "w00": (nf, nc),      "b00": (nc,),
        "w01": (nc, nc),      "b01": (nc,),
        "w1":  (nc, 256),     "b1":  (256,),
        "w2":  (256, 256),    "b2":  (256,),
        "w3":  (256, nlatent), "b3": (nlatent,),
        "w4":  (nlatent, nlatent), "b4": (nlatent,),
        "wl1": (nlatent, nlatent), "bl1": (nlatent,),
        "wl2": (nlatent, nlatent), "bl2": (nlatent,),
        "wl3": (nlatent, nlatent), "bl3": (nlatent,),
    }
    params = {}
    keys = jax.random.split(key, len(shapes))
    for k, (name, shp) in zip(keys, sorted(shapes.items())):
        fan_in = shp[0] if len(shp) == 2 else 1
        params[name] = (jax.random.normal(k, shp, jnp.float32)
                        / jnp.sqrt(jnp.float32(fan_in)))
    return params


def reference_forward(x, cond, p):
    """Pure-JAX f32 reference matching the PyTorch module semantics."""
    lr = lambda v: jnp.where(v > 0, v, NEG_SLOPE * v)

    def conv2d(h, w, b):  # 1x1 conv, NCHW
        return jnp.einsum("bchw,cd->bdhw", h, w) + b[None, :, None, None]

    def conv1d(h, w, b):  # 1x1 conv, NCL
        return jnp.einsum("bcl,cd->bdl", h, w) + b[None, :, None]

    h = lr(conv2d(x, p["w00"], p["b00"]) + conv2d(cond, p["w01"], p["b01"]))
    h = lr(conv2d(h, p["w1"], p["b1"]))
    h = lr(conv2d(h, p["w2"], p["b2"]))
    h = lr(conv2d(h, p["w3"], p["b3"]))
    h = conv2d(h, p["w4"], p["b4"])
    h = jnp.max(h, axis=3)
    h = lr(conv1d(h, p["wl1"], p["bl1"]))
    h = lr(conv1d(h, p["wl2"], p["bl2"]))
    h = conv1d(h, p["wl3"], p["bl3"])
    return h


if __name__ == "__main__":
    B, nf, nc = 2, 3, 3
    nfps, nsample = 8, 16
    nlatent = 256  # small, lane-aligned latent (module default is 1024)

    key = jax.random.PRNGKey(0)
    kx, kc, kp = jax.random.split(key, 3)
    x = jax.random.normal(kx, (B, nf, nfps, nsample), jnp.float32)
    cond = jax.random.normal(kc, (B, nc, nfps, nsample), jnp.float32)
    params = init_params(kp, nf=nf, nc=nc, nlatent=nlatent)
    packed = pack_params(params, nf=nf, nc=nc, nlatent=nlatent)   # once, outside jit

    ref = reference_forward(x, cond, params)
    scale = float(jnp.max(jnp.abs(ref)))
    tol = 6e-2 * scale + 3e-2   # bf16 matmuls + bf16 epilogues vs f32 reference

    # Fused path (auto-selected because G = B*nfps is small).
    fwd = jax.jit(functools.partial(pointnet_forward, nlatent=nlatent))
    out = jax.block_until_ready(fwd(x, cond, packed))
    assert out.shape == (B, nlatent, nfps), out.shape
    assert float(jnp.max(jnp.abs(out - ref))) <= tol, float(jnp.max(jnp.abs(out - ref)))

    # Two-stage (split) path, exercised explicitly so both code paths are validated.
    fwd_split = jax.jit(functools.partial(pointnet_forward, nlatent=nlatent,
                                          force_split=True))
    out2 = jax.block_until_ready(fwd_split(x, cond, packed))
    assert float(jnp.max(jnp.abs(out2 - ref))) <= tol, float(jnp.max(jnp.abs(out2 - ref)))

    print("KERNEL_OK")
</pallas_src>

<mosaic_0001>
module attributes {stable_mosaic.version = 11 : i64} {
  func.func @_fused_kernel(%arg0: i32, %arg1: memref<8x16x8xbf16, #tpu.memory_space<vmem>>, %arg2: memref<8x128xbf16, #tpu.memory_space<vmem>>, %arg3: memref<128x256xbf16, #tpu.memory_space<vmem>>, %arg4: memref<256x256xbf16, #tpu.memory_space<vmem>>, %arg5: memref<256x256xbf16, #tpu.memory_space<vmem>>, %arg6: memref<256x256xbf16, #tpu.memory_space<vmem>>, %arg7: memref<256x256xbf16, #tpu.memory_space<vmem>>, %arg8: memref<256x256xbf16, #tpu.memory_space<vmem>>, %arg9: memref<256x256xbf16, #tpu.memory_space<vmem>>, %arg10: memref<8x256xbf16, #tpu.memory_space<vmem>>, %arg11: memref<8x256xf32, #tpu.memory_space<vmem>>, %arg12: memref<8x256xf32, #tpu.memory_space<vmem>>) attributes {dimension_semantics = [#tpu.dimension_semantics<parallel>], iteration_bounds = array<i64: 2>, scalar_prefetch = 0 : i64, scratch_operands = 0 : i64, tpu.core_type = #tpu.core_type<tc>, window_params = [{transform_indices = @transform_0, window_bounds = array<i64: 8, 16, 8>}, {pipeline_mode = #tpu.pipeline_mode<synchronous>, transform_indices = @transform_1, window_bounds = array<i64: 8, 128>}, {pipeline_mode = #tpu.pipeline_mode<synchronous>, transform_indices = @transform_2, window_bounds = array<i64: 128, 256>}, {pipeline_mode = #tpu.pipeline_mode<synchronous>, transform_indices = @transform_3, window_bounds = array<i64: 256, 256>}, {pipeline_mode = #tpu.pipeline_mode<synchronous>, transform_indices = @transform_4, window_bounds = array<i64: 256, 256>}, {pipeline_mode = #tpu.pipeline_mode<synchronous>, transform_indices = @transform_5, window_bounds = array<i64: 256, 256>}, {pipeline_mode = #tpu.pipeline_mode<synchronous>, transform_indices = @transform_6, window_bounds = array<i64: 256, 256>}, {pipeline_mode = #tpu.pipeline_mode<synchronous>, transform_indices = @transform_7, window_bounds = array<i64: 256, 256>}, {pipeline_mode = #tpu.pipeline_mode<synchronous>, transform_indices = @transform_8, window_bounds = array<i64: 256, 256>}, {pipeline_mode = #tpu.pipeline_mode<synchronous>, transform_indices = @transform_9, window_bounds = array<i64: 8, 256>}, {pipeline_mode = #tpu.pipeline_mode<synchronous>, transform_indices = @transform_10, window_bounds = array<i64: 8, 256>}, {transform_indices = @transform_11, window_bounds = array<i64: 8, 256>}]} {
    %c0 = arith.constant 0 : index
    %c0_0 = arith.constant 0 : index
    %c0_1 = arith.constant 0 : index
    %0 = vector.load %arg1[%c0, %c0_0, %c0_1] : memref<8x16x8xbf16, #tpu.memory_space<vmem>>, vector<8x16x8xbf16>
    %1 = vector.shape_cast %0 : vector<8x16x8xbf16> to vector<128x8xbf16>
    %c0_2 = arith.constant 0 : index
    %c0_3 = arith.constant 0 : index
    %2 = vector.load %arg2[%c0_2, %c0_3] : memref<8x128xbf16, #tpu.memory_space<vmem>>, vector<8x128xbf16>
    %cst = arith.constant dense<0.000000e+00> : vector<128x128xf32>
    %3 = tpu.matmul %1, %2, %cst {dimension_numbers = #tpu.dot_dimension_numbers<[1], [0], [0], [1], [0, 0, 1, 1], [], []>} : vector<128x8xbf16>, vector<8x128xbf16>, vector<128x128xf32> -> vector<128x128xf32>
    %4 = arith.truncf %3 : vector<128x128xf32> to vector<128x128xbf16>
    %c0_4 = arith.constant 0 : index
    %c0_5 = arith.constant 0 : index
    %5 = vector.load %arg10[%c0_4, %c0_5] : memref<8x256xbf16, #tpu.memory_space<vmem>>, vector<1x128xbf16>
    %6 = vector.broadcast %5 : vector<1x128xbf16> to vector<128x128xbf16>
    %7 = arith.addf %4, %6 : vector<128x128xbf16>
    %cst_6 = arith.constant 1.000980e-02 : bf16
    %8 = vector.broadcast %cst_6 : bf16 to vector<128x128xbf16>
    %9 = arith.mulf %8, %7 : vector<128x128xbf16>
    %10 = arith.maximumf %7, %9 : vector<128x128xbf16>
    %c0_7 = arith.constant 0 : index
    %c0_8 = arith.constant 0 : index
    %11 = vector.load %arg3[%c0_7, %c0_8] : memref<128x256xbf16, #tpu.memory_space<vmem>>, vector<128x256xbf16>
    %cst_9 = arith.constant dense<0.000000e+00> : vector<128x256xf32>
    %12 = tpu.matmul %10, %11, %cst_9 {dimension_numbers = #tpu.dot_dimension_numbers<[1], [0], [0], [1], [0, 0, 1, 1], [], []>} : vector<128x128xbf16>, vector<128x256xbf16>, vector<128x256xf32> -> vector<128x256xf32>
    %13 = arith.truncf %12 : vector<128x256xf32> to vector<128x256xbf16>
    %c1 = arith.constant 1 : index
    %c0_10 = arith.constant 0 : index
    %14 = vector.load %arg10[%c1, %c0_10] : memref<8x256xbf16, #tpu.memory_space<vmem>>, vector<1x256xbf16>
    %15 = vector.broadcast %14 : vector<1x256xbf16> to vector<128x256xbf16>
    %16 = arith.addf %13, %15 : vector<128x256xbf16>
    %cst_11 = arith.constant 1.000980e-02 : bf16
    %17 = vector.broadcast %cst_11 : bf16 to vector<128x256xbf16>
    %18 = arith.mulf %17, %16 : vector<128x256xbf16>
    %19 = arith.maximumf %16, %18 : vector<128x256xbf16>
    %c0_12 = arith.constant 0 : index
    %c0_13 = arith.constant 0 : index
    %20 = vector.load %arg4[%c0_12, %c0_13] : memref<256x256xbf16, #tpu.memory_space<vmem>>, vector<256x256xbf16>
    %cst_14 = arith.constant dense<0.000000e+00> : vector<128x256xf32>
    %21 = tpu.matmul %19, %20, %cst_14 {dimension_numbers = #tpu.dot_dimension_numbers<[1], [0], [0], [1], [0, 0, 1, 1], [], []>} : vector<128x256xbf16>, vector<256x256xbf16>, vector<128x256xf32> -> vector<128x256xf32>
    %22 = arith.truncf %21 : vector<128x256xf32> to vector<128x256xbf16>
    %c2 = arith.constant 2 : index
    %c0_15 = arith.constant 0 : index
    %23 = vector.load %arg10[%c2, %c0_15] : memref<8x256xbf16, #tpu.memory_space<vmem>>, vector<1x256xbf16>
    %24 = vector.broadcast %23 : vector<1x256xbf16> to vector<128x256xbf16>
    %25 = arith.addf %22, %24 : vector<128x256xbf16>
    %cst_16 = arith.constant 1.000980e-02 : bf16
    %26 = vector.broadcast %cst_16 : bf16 to vector<128x256xbf16>
    %27 = arith.mulf %26, %25 : vector<128x256xbf16>
    %28 = arith.maximumf %25, %27 : vector<128x256xbf16>
    %c0_17 = arith.constant 0 : index
    %c0_18 = arith.constant 0 : index
    %29 = vector.load %arg5[%c0_17, %c0_18] : memref<256x256xbf16, #tpu.memory_space<vmem>>, vector<256x256xbf16>
    %cst_19 = arith.constant dense<0.000000e+00> : vector<128x256xf32>
    %30 = tpu.matmul %28, %29, %cst_19 {dimension_numbers = #tpu.dot_dimension_numbers<[1], [0], [0], [1], [0, 0, 1, 1], [], []>} : vector<128x256xbf16>, vector<256x256xbf16>, vector<128x256xf32> -> vector<128x256xf32>
    %31 = arith.truncf %30 : vector<128x256xf32> to vector<128x256xbf16>
    %c3 = arith.constant 3 : index
    %c0_20 = arith.constant 0 : index
    %32 = vector.load %arg10[%c3, %c0_20] : memref<8x256xbf16, #tpu.memory_space<vmem>>, vector<1x256xbf16>
    %33 = vector.broadcast %32 : vector<1x256xbf16> to vector<128x256xbf16>
    %34 = arith.addf %31, %33 : vector<128x256xbf16>
    %cst_21 = arith.constant 1.000980e-02 : bf16
    %35 = vector.broadcast %cst_21 : bf16 to vector<128x256xbf16>
    %36 = arith.mulf %35, %34 : vector<128x256xbf16>
    %37 = arith.maximumf %34, %36 : vector<128x256xbf16>
    %c0_22 = arith.constant 0 : index
    %c0_23 = arith.constant 0 : index
    %38 = vector.load %arg6[%c0_22, %c0_23] : memref<256x256xbf16, #tpu.memory_space<vmem>>, vector<256x256xbf16>
    %cst_24 = arith.constant dense<0.000000e+00> : vector<128x256xf32>
    %39 = tpu.matmul %37, %38, %cst_24 {dimension_numbers = #tpu.dot_dimension_numbers<[1], [0], [0], [1], [0, 0, 1, 1], [], []>} : vector<128x256xbf16>, vector<256x256xbf16>, vector<128x256xf32> -> vector<128x256xf32>
    %40 = arith.truncf %39 : vector<128x256xf32> to vector<128x256xbf16>
    %c4 = arith.constant 4 : index
    %c0_25 = arith.constant 0 : index
    %41 = vector.load %arg10[%c4, %c0_25] : memref<8x256xbf16, #tpu.memory_space<vmem>>, vector<1x256xbf16>
    %42 = vector.broadcast %41 : vector<1x256xbf16> to vector<128x256xbf16>
    %43 = arith.addf %40, %42 : vector<128x256xbf16>
    %44 = vector.shape_cast %43 : vector<128x256xbf16> to vector<8x16x256xbf16>
    %cst_26 = arith.constant dense<0xFF80> : vector<8x256xbf16>
    %45 = vector.multi_reduction <maximumf>, %44, %cst_26 [1] : vector<8x16x256xbf16> to vector<8x256xbf16>
    %c0_27 = arith.constant 0 : index
    %c0_28 = arith.constant 0 : index
    %46 = vector.load %arg7[%c0_27, %c0_28] : memref<256x256xbf16, #tpu.memory_space<vmem>>, vector<256x256xbf16>
    %cst_29 = arith.constant dense<0.000000e+00> : vector<8x256xf32>
    %47 = tpu.matmul %45, %46, %cst_29 {dimension_numbers = #tpu.dot_dimension_numbers<[1], [0], [0], [1], [0, 0, 1, 1], [], []>} : vector<8x256xbf16>, vector<256x256xbf16>, vector<8x256xf32> -> vector<8x256xf32>
    %c0_30 = arith.constant 0 : index
    %c0_31 = arith.constant 0 : index
    %48 = vector.load %arg11[%c0_30, %c0_31] : memref<8x256xf32, #tpu.memory_space<vmem>>, vector<1x256xf32>
    %49 = vector.broadcast %48 : vector<1x256xf32> to vector<8x256xf32>
    %50 = arith.addf %47, %49 : vector<8x256xf32>
    %cst_32 = arith.constant 0.00999999977 : f32
    %51 = vector.broadcast %cst_32 : f32 to vector<8x256xf32>
    %52 = arith.mulf %51, %50 : vector<8x256xf32>
    %53 = arith.maximumf %50, %52 : vector<8x256xf32>
    %54 = arith.truncf %53 : vector<8x256xf32> to vector<8x256xbf16>
    %c0_33 = arith.constant 0 : index
    %c0_34 = arith.constant 0 : index
    %55 = vector.load %arg8[%c0_33, %c0_34] : memref<256x256xbf16, #tpu.memory_space<vmem>>, vector<256x256xbf16>
    %cst_35 = arith.constant dense<0.000000e+00> : vector<8x256xf32>
    %56 = tpu.matmul %54, %55, %cst_35 {dimension_numbers = #tpu.dot_dimension_numbers<[1], [0], [0], [1], [0, 0, 1, 1], [], []>} : vector<8x256xbf16>, vector<256x256xbf16>, vector<8x256xf32> -> vector<8x256xf32>
    %c1_36 = arith.constant 1 : index
    %c0_37 = arith.constant 0 : index
    %57 = vector.load %arg11[%c1_36, %c0_37] : memref<8x256xf32, #tpu.memory_space<vmem>>, vector<1x256xf32>
    %58 = vector.broadcast %57 : vector<1x256xf32> to vector<8x256xf32>
    %59 = arith.addf %56, %58 : vector<8x256xf32>
    %cst_38 = arith.constant 0.00999999977 : f32
    %60 = vector.broadcast %cst_38 : f32 to vector<8x256xf32>
    %61 = arith.mulf %60, %59 : vector<8x256xf32>
    %62 = arith.maximumf %59, %61 : vector<8x256xf32>
    %63 = arith.truncf %62 : vector<8x256xf32> to vector<8x256xbf16>
    %c0_39 = arith.constant 0 : index
    %c0_40 = arith.constant 0 : index
    %64 = vector.load %arg9[%c0_39, %c0_40] : memref<256x256xbf16, #tpu.memory_space<vmem>>, vector<256x256xbf16>
    %cst_41 = arith.constant dense<0.000000e+00> : vector<8x256xf32>
    %65 = tpu.matmul %63, %64, %cst_41 {dimension_numbers = #tpu.dot_dimension_numbers<[1], [0], [0], [1], [0, 0, 1, 1], [], []>} : vector<8x256xbf16>, vector<256x256xbf16>, vector<8x256xf32> -> vector<8x256xf32>
    %c2_42 = arith.constant 2 : index
    %c0_43 = arith.constant 0 : index
    %66 = vector.load %arg11[%c2_42, %c0_43] : memref<8x256xf32, #tpu.memory_space<vmem>>, vector<1x256xf32>
    %67 = vector.broadcast %66 : vector<1x256xf32> to vector<8x256xf32>
    %68 = arith.addf %65, %67 : vector<8x256xf32>
    %c0_44 = arith.constant 0 : index
    %c0_45 = arith.constant 0 : index
    %69 = vector.load %arg12[%c0_44, %c0_45] : memref<8x256xf32, #tpu.memory_space<vmem>>, vector<8x256xf32>
    tpu.vector_store %arg12[%c0_44, %c0_45], %68 {strides = array<i32>} : memref<8x256xf32, #tpu.memory_space<vmem>>, vector<8x256xf32>,
    return
  }
  func.func @transform_0(%arg0: i32) -> (i32, i32, i32) {
    %c0_i32 = arith.constant 0 : i32
    %c0_i32_0 = arith.constant 0 : i32
    %c0_i32_1 = arith.constant 0 : i32
    return %arg0, %c0_i32, %c0_i32_0 : i32, i32, i32
  }
  func.func @transform_1(%arg0: i32) -> (i32, i32) {
    %c0_i32 = arith.constant 0 : i32
    %c0_i32_0 = arith.constant 0 : i32
    %c0_i32_1 = arith.constant 0 : i32
    return %c0_i32, %c0_i32_0 : i32, i32
  }
  func.func @transform_2(%arg0: i32) -> (i32, i32) {
    %c0_i32 = arith.constant 0 : i32
    %c0_i32_0 = arith.constant 0 : i32
    %c0_i32_1 = arith.constant 0 : i32
    return %c0_i32, %c0_i32_0 : i32, i32
  }
  func.func @transform_3(%arg0: i32) -> (i32, i32) {
    %c0_i32 = arith.constant 0 : i32
    %c0_i32_0 = arith.constant 0 : i32
    %c0_i32_1 = arith.constant 0 : i32
    return %c0_i32, %c0_i32_0 : i32, i32
  }
  func.func @transform_4(%arg0: i32) -> (i32, i32) {
    %c0_i32 = arith.constant 0 : i32
    %c0_i32_0 = arith.constant 0 : i32
    %c0_i32_1 = arith.constant 0 : i32
    return %c0_i32, %c0_i32_0 : i32, i32
  }
  func.func @transform_5(%arg0: i32) -> (i32, i32) {
    %c0_i32 = arith.constant 0 : i32
    %c0_i32_0 = arith.constant 0 : i32
    %c0_i32_1 = arith.constant 0 : i32
    return %c0_i32, %c0_i32_0 : i32, i32
  }
  func.func @transform_6(%arg0: i32) -> (i32, i32) {
    %c0_i32 = arith.constant 0 : i32
    %c0_i32_0 = arith.constant 0 : i32
    %c0_i32_1 = arith.constant 0 : i32
    return %c0_i32, %c0_i32_0 : i32, i32
  }
  func.func @transform_7(%arg0: i32) -> (i32, i32) {
    %c0_i32 = arith.constant 0 : i32
    %c0_i32_0 = arith.constant 0 : i32
    %c0_i32_1 = arith.constant 0 : i32
    return %c0_i32, %c0_i32_0 : i32, i32
  }
  func.func @transform_8(%arg0: i32) -> (i32, i32) {
    %c0_i32 = arith.constant 0 : i32
    %c0_i32_0 = arith.constant 0 : i32
    %c0_i32_1 = arith.constant 0 : i32
    return %c0_i32, %c0_i32_0 : i32, i32
  }
  func.func @transform_9(%arg0: i32) -> (i32, i32) {
    %c0_i32 = arith.constant 0 : i32
    %c0_i32_0 = arith.constant 0 : i32
    %c0_i32_1 = arith.constant 0 : i32
    return %c0_i32, %c0_i32_0 : i32, i32
  }
  func.func @transform_10(%arg0: i32) -> (i32, i32) {
    %c0_i32 = arith.constant 0 : i32
    %c0_i32_0 = arith.constant 0 : i32
    %c0_i32_1 = arith.constant 0 : i32
    return %c0_i32, %c0_i32_0 : i32, i32
  }
  func.func @transform_11(%arg0: i32) -> (i32, i32) {
    %c0_i32 = arith.constant 0 : i32
    %c0_i32_0 = arith.constant 0 : i32
    return %arg0, %c0_i32 : i32, i32
  }
}

</mosaic_0001>

<bundles_post_ra>
// kernel: pointnet_forward.1
= control target key start
LH: loop header
LB: loop body
LE: loop exit
PB: predicated region body
PF: predicated region fallthrough
CT: control target
= control target key end

     0   :  { %s4774_s0 = inlined_call_operand.vmem [shape: bf16[16,16,8], index: 0, kind: input, shape index: {}]   ;;  %s4775_s1 = inlined_call_operand.vmem [shape: bf16[8,128], index: 1, kind: input, shape index: {}]   ;;  %s4776_s2 = inlined_call_operand.vmem [shape: bf16[128,256], index: 2, kind: input, shape index: {}]   ;;  %s4777_s3 = inlined_call_operand.vmem [shape: bf16[256,256], index: 3, kind: input, shape index: {}]   ;;  %s4778_s4 = inlined_call_operand.vmem [shape: bf16[256,256], index: 4, kind: input, shape index: {}]   ;;  %s4779_s5 = inlined_call_operand.hbm [shape: bf16[256,256], index: 5, kind: input, shape index: {}]   ;;  %s4780_s6 = inlined_call_operand.hbm [shape: bf16[256,256], index: 6, kind: input, shape index: {}]   ;;  %s4781_s7 = inlined_call_operand.hbm [shape: bf16[256,256], index: 7, kind: input, shape index: {}]   ;;  %s4782_s8 = inlined_call_operand.hbm [shape: bf16[256,256], index: 8, kind: input, shape index: {}]   ;;  %s4783_s9 = inlined_call_operand.vmem [shape: bf16[8,256], index: 9, kind: input, shape index: {}]   ;;  %s4784_s10 = inlined_call_operand.vmem [shape: f32[8,256], index: 10, kind: input, shape index: {}]   ;;  %s4785_s11 = inlined_call_operand.hbm [shape: f32[16,256], index: 11, kind: output, shape index: {}]  }
   0x1   :  { %4796 = sst [smem:[#allocation21_spill]] %s4785_s11 }
   0x2   :  { %16 = vsyncpa [#allocation3], 0 }
   0x3   :  { %17 = vsyncpa [#allocation6], 0 }
   0x4   :  { %18 = vsyncpa [#allocation9], 0 }
   0x5   :  { %19 = vsyncpa [#allocation4], 0 }
   0x6   :  { %21 = vsyncpa [#allocation4 + $0x1], 0  ;;  %s4129_s17 = smov 0   ;;  %s4131_s18 = smov 0  }
   0x7   :  { %s4133_s19 = smov 0   ;;  %s4135_s20 = smov 0  }
   0x8 LB: > { %4797 = sst [smem:[#allocation15_spill]] %s4047_s17  ;;  %s4150_s21 = sadd.s32 4294967295, %s4059_s20   ;;  %s4059_s20 = sphi %s4135_s20, %s4821_s20   ;;  %s4055_s19 = sphi %s4133_s19, %s4823_s19   ;;  %s4051_s18 = sphi %s4131_s18, %s4825_s18   ;;  %s4047_s17 = sphi %s4129_s17, %s4824_s17  }
   0x9   : > { %4798 = sst [smem:[#allocation16_spill]] %s4055_s19  ;;  %s3181_s22 = sadd.s32 4294967294, %s4059_s20  }
   0xa   : > { %4799 = sst [smem:[#allocation17_spill]] %s4059_s20  ;;  %s4154_s23 = sadd.s32 1, %s4059_s20  }
   0xb   : > { %4800 = sst [smem:[#allocation18_spill]] %s4154_s23  ;;  %s270_s24 = sadd.s32 1, %s4055_s19 }
   0xc   : > { %s267_s25 = ssub.s32 %s4059_s20, %s4154_s23  ;;  %p280_p0 = scmp.ne.s32.totalorder %s4055_s19, %s4051_s18 }
   0xd   : > { %p268_p1 = scmp.eq.s32.totalorder %s267_s25, 0  ;;  %p281_p2 = scmp.eq.s32.totalorder %s4150_s21, 1 }
   0xe   : > { %p286_p3 = scmp.ne.s32.totalorder %s4051_s18, %s4047_s17  ;;  %p287_p4 = scmp.eq.s32.totalorder %s3181_s22, 1 }
   0xf   : > { %s4165_s26 = scalar_select %p268_p1, %s4055_s19, %s270_s24  }
  0x10   : > { %p4167_p5 = por %p281_p2, %p280_p0  ;;  %p4171_p6 = por %p287_p4, %p286_p3 }
  0x11   : > { %4801 = sst [smem:[#allocation19_spill]] %s4165_s26  ;;  %p3182_p7 = scmp.ge.s32.totalorder %s4059_s20, 1 }
  0x12   : > { %s4802_s27 = scalar_select %p4167_p5, 1, 0 }
  0x13   : > { %s4803_s28 = scalar_select %p4171_p6, 1, 0 }
  0x14   : > { %p294_p8 = scmp.lt.s32.totalorder %s4059_s20, 3  ;;  %p4789_p9 = scmp.eq.s32.totalorder %s4150_s21, 0 }
  0x15   : > { %4804 = sst [smem:[#allocation20_spill]] %s4803_s28  ;;  %s4061_s30 = smov [#allocation5]  }
  0x16   : > { %p4178_p10 = pnand %p3182_p7, %p294_p8  ;;  %s331_s12 = sshll.u32 %s4061_s30, 4  ;;  %s4184_s12 = int_to_ptr.vmem [resolvable:$true] %s331_s12 }
  0x17   : > { %s4062_s14 = smov [#allocation2]   ;;  %s4063_s16 = smov [#allocation7]  }
  0x18   : > { %s4805_s29 = scalar_select %p4178_p10, 1, 0 }
  0x19   : > { %p3482_p11 = pneg %p4178_p10  ;;  %s318_s15 = sshll.u32 %s4062_s14, 4  ;;  %s4192_s15 = int_to_ptr.vmem [resolvable:$true] %s318_s15 }
  0x1a   : > { %s4194_s22 = sshll.u32 %s4063_s16, 4  ;;  %s3873_s26 = scalar_lea.hbm %s4780_s6, 4096  ;;  %s345_s22 = int_to_ptr.vmem [resolvable:$true] %s4194_s22 }
  0x1b   : > { %p4188_p12 = pnand %p4789_p9, %p3482_p11  ;;  %p3874_p13 = scmp.ne.s32.totalorder %s4780_s6, %s3873_s26 }
  0x1c   : > { %p3880_p3 = scmp.lt.u32.totalorder %s3873_s26, %s4780_s6 }
  0x1d   : > { %p4204_p0 = pneg %p4188_p12 }
  0x1f   : > { %p3876_p1 = pnand %p4204_p0, %p3874_p13 }
  0x21   : > { %p3877_p2 = pneg %p3876_p1 }
  0x23   : > { %p3882_p4 = pnand %p3880_p3, %p3877_p2 }
  0x25   : > { %3885 = shalt.err (!%p3882_p4)
}
  0x26   : > { %s3886_s19 = scalar_lea.vmem %s4184_s12, 4096  ;;  %p3894_p9 = scmp.lt.s32.totalorder %s4184_s12, %s4184_s12 }
  0x27   : > { %p3887_p7 = scmp.ne.s32.totalorder %s4184_s12, %s3886_s19  ;;  %p3895_p6 = scmp.lt.s32.totalorder %s3886_s19, %s3886_s19 }
  0x29   : > { %p3889_p8 = pnand %p3887_p7, %p4204_p0  ;;  %p3896_p13 = por %p3895_p6, %p3894_p9 }
  0x2b   : > { %p3890_p11 = pneg %p3889_p8 }
  0x2d   : > { %p3897_p1 = pnand %p3896_p13, %p3890_p11 }
  0x2f   : > { %3900 = shalt.err (!%p3897_p1)
}
  0x30   : > { %s4064_s24 = smov 128   ;;  %s4065_s26 = smov 8  }
  0x31   : > { %3488 = dma.hbm_to_vmem [thread:$0]  (!%p4188_p12), %s4780_s6, 4096, %s4184_s12, [#allocation6], %s4064_s24, %s4064_s24, %s4065_s26  }
  0x32   : > { %s3901_s19 = scalar_lea.hbm %s4779_s5, 4096 }
  0x33   : > { %p3902_p6 = scmp.ne.s32.totalorder %s4779_s5, %s3901_s19  ;;  %p3908_p3 = scmp.lt.u32.totalorder %s3901_s19, %s4779_s5 }
  0x35   : > { %p3904_p9 = pnand %p3902_p6, %p4204_p0 }
  0x37   : > { %p3905_p2 = pneg %p3904_p9 }
  0x39   : > { %p3910_p4 = pnand %p3908_p3, %p3905_p2 }
  0x3b   : > { %3913 = shalt.err (!%p3910_p4)
}
  0x3c   : > { %s3914_s12 = scalar_lea.vmem %s4192_s15, 4096  ;;  %p3922_p13 = scmp.lt.s32.totalorder %s4192_s15, %s4192_s15 }
  0x3d   : > { %p3915_p7 = scmp.ne.s32.totalorder %s4192_s15, %s3914_s12  ;;  %p3923_p1 = scmp.lt.s32.totalorder %s3914_s12, %s3914_s12 }
  0x3f   : > { %p3917_p8 = pnand %p3915_p7, %p4204_p0  ;;  %p3924_p6 = por %p3923_p1, %p3922_p13 }
  0x41   : > { %p3918_p11 = pneg %p3917_p8 }
  0x43   : > { %p3925_p9 = pnand %p3924_p6, %p3918_p11 }
  0x45   : > { %3928 = shalt.err (!%p3925_p9)
}
  0x46   : > { %3485 = dma.hbm_to_vmem [thread:$0]  (!%p4188_p12), %s4779_s5, 4096, %s4192_s15, [#allocation3], %s4064_s24, %s4064_s24, %s4065_s26  }
  0x47   : > { %s3929_s25 = scalar_lea.hbm %s4781_s7, 4096 }
  0x48   : > { %p3930_p2 = scmp.ne.s32.totalorder %s4781_s7, %s3929_s25  ;;  %p3936_p7 = scmp.lt.u32.totalorder %s3929_s25, %s4781_s7 }
  0x4a   : > { %p3932_p3 = pnand %p3930_p2, %p4204_p0 }
  0x4c   : > { %p3933_p4 = pneg %p3932_p3 }
  0x4e   : > { %p3938_p8 = pnand %p3936_p7, %p3933_p4 }
  0x50   : > { %3941 = shalt.err (!%p3938_p8)
}
  0x51   : > { %s3942_s12 = scalar_lea.vmem %s345_s22, 4096  ;;  %p3950_p6 = scmp.lt.s32.totalorder %s345_s22, %s345_s22 }
  0x52   : > { %p3943_p11 = scmp.ne.s32.totalorder %s345_s22, %s3942_s12  ;;  %p3951_p9 = scmp.lt.s32.totalorder %s3942_s12, %s3942_s12 }
  0x54   : > { %p3945_p13 = pnand %p3943_p11, %p4204_p0  ;;  %p3952_p5 = por %p3951_p9, %p3950_p6 }
  0x56   : > { %p3946_p1 = pneg %p3945_p13 }
  0x58   : > { %p3953_p10 = pnand %p3952_p5, %p3946_p1 }
  0x5a   : > { %3956 = shalt.err (!%p3953_p10)
}
  0x5b   : > { %3491 = dma.hbm_to_vmem [thread:$0]  (!%p4188_p12), %s4781_s7, 4096, %s345_s22, [#allocation6], %s4064_s24, %s4064_s24, %s4065_s26  }
  0x5c   : > { %s4066_s17 = smov [#allocation8]   ;;  %s3957_s30 = scalar_lea.hbm %s4782_s8, 4096 }
  0x5d   : > { %s357_s20 = sshll.u32 %s4066_s17, 4  ;;  %p3958_p5 = scmp.ne.s32.totalorder %s4782_s8, %s3957_s30  ;;  %s358_s20 = int_to_ptr.vmem [resolvable:$true] %s357_s20 }
  0x5e   : > { %p3964_p3 = scmp.lt.u32.totalorder %s3957_s30, %s4782_s8 }
  0x5f   : > { %p3960_p10 = pnand %p3958_p5, %p4204_p0 }
  0x61   : > { %p3961_p2 = pneg %p3960_p10 }
  0x63   : > { %p3966_p4 = pnand %p3964_p3, %p3961_p2 }
  0x65   : > { %3969 = shalt.err (!%p3966_p4)
}
  0x66   : > { %s3970_s22 = scalar_lea.vmem %s358_s20, 4096  ;;  %p3978_p13 = scmp.lt.s32.totalorder %s358_s20, %s358_s20 }
  0x67   : > { %p3971_p7 = scmp.ne.s32.totalorder %s358_s20, %s3970_s22  ;;  %p3979_p1 = scmp.lt.s32.totalorder %s3970_s22, %s3970_s22 }
  0x69   : > { %p3973_p8 = pnand %p3971_p7, %p4204_p0  ;;  %p3980_p6 = por %p3979_p1, %p3978_p13 }
  0x6b   : > { %p3974_p11 = pneg %p3973_p8 }
  0x6d   : > { %p3981_p9 = pnand %p3980_p6, %p3974_p11 }
  0x6f   : > { %3984 = shalt.err (!%p3981_p9)
}
  0x70   : > { %3494 = dma.hbm_to_vmem [thread:$0]  (!%p4188_p12), %s4782_s8, 4096, %s358_s20, [#allocation9], %s4064_s24, %s4064_s24, %s4065_s26  }
  0x71   : > { %p4808_p5 = scmp.ne.s32.totalorder %s4805_s29, 0 }
  0x72   : > { %p4809_p0 = scmp.eq.s32.totalorder (!%p4808_p5), %s4150_s21, 0 }
  0x73   : > { %389 = sbr.rel (%p4808_p5) target bundleno = 2004 (0x7d4), region = 64 }
  0x7a   : > { %4030 = dma.done.wait (%p4809_p0), [#allocation3], 4096   ;;  %p4810_p10 = pmov %p4809_p0 }
  0x7b   : > { %p4811_p2 = pmov %p4809_p0 }
  0x7c   : > { %4032 = vsyncadd (%p4810_p10), [#allocation3], 4294963200 }
  0x7d   : > { %4034 = dma.done.wait (%p4811_p2), [#allocation6], 8192   ;;  %p4812_p3 = pmov %p4809_p0 }
  0x7e   : > { %p4813_p4 = pmov %p4809_p0 }
  0x7f   : > { %4036 = vsyncadd (%p4812_p3), [#allocation6], 4294959104 }
  0x80   : > { %4038 = dma.done.wait (%p4813_p4), [#allocation9], 4096   ;;  %p4814_p12 = pmov %p4809_p0 }
  0x81   : > { %s3194_s23 = sshll.u32 %s4150_s21, 3  ;;  %vm533_vm0 = vcmask 1043456   ;;  %vm508_vm1 = vcmask 64512   ;;  %v467_v0 = vld [vmem:[%s4775_s1] sm:$0xf]  ;;  %v4067_v26 = vmov 0   ;;  %v646_v53 = vlaneseq }
  0x82   : > { %4040 = vsyncadd (%p4814_p12), [#allocation9], 4294963200  ;;  %p443_p7 = scmp.lt.s32.totalorder %s3194_s23, 15  ;;  %3463 = vmatprep.subr.msk.bf16.mxu0 %vm533_vm0, %v467_v0  ;;  %v535_v1 = vsel %vm533_vm0, %v467_v0, 0  ;;  %v3555_v6 = vld [vmem:[%s4776_s2 + $0x4] ss:$8 sps:$4 sm:$0xff]   ;;  %802 = vmatprep.mubr.bf16.mxu1 %v4067_v26 }
  0x83   : > { %3446 = vmatpush3.bf16.msra.mxu0 %v535_v1  ;;  %v3557_v7 = vld [vmem:[%s4776_s2] ss:$8 sps:$4 sm:$0xff]   ;;  %v3558_v9 = vld [vmem:[%s4776_s2 + $0x14] ss:$8 sps:$4 sm:$0xff]   ;;  %770 = vmatprep.subr.bf16.mxu1 %v3555_v6  ;;  %v3560_v10 = vld [vmem:[%s4776_s2 + $0x10] ss:$8 sps:$4 sm:$0xff]  }
  0x84   : > { %s4827_s23 = smov (!%p443_p7, %s3194_s23), 15  ;;  %771 = vmatpush1.bf16.msra.mxu1 %v3557_v7  ;;  %v3561_v11 = vld [vmem:[%s4776_s2 + $0x24] ss:$8 sps:$4 sm:$0xff]   ;;  %v3563_v12 = vld [vmem:[%s4776_s2 + $0x20] ss:$8 sps:$4 sm:$0xff]   ;;  %v4463_v54 = vshrl.u32 %v646_v53, 7 }
  0x85   : > { %s3434_s29 = sshll.u32 %s4827_s23, 3  ;;  %772 = vmatprep.subr.bf16.mxu1 %v3558_v9  ;;  %v3564_v14 = vld [vmem:[%s4776_s2 + $0x34] ss:$8 sps:$4 sm:$0xff]   ;;  %v3566_v16 = vld [vmem:[%s4776_s2 + $0x30] ss:$8 sps:$4 sm:$0xff]   ;;  %vm2334_vm2 = vcmask 1041409  }
  0x86   : > { %s4315_s26 = scalar_lea.vmem %s4774_s0, %s3434_s29  ;;  %v3567_v17 = vld [vmem:[%s4776_s2 + $0x44] ss:$8 sps:$4 sm:$0xff]   ;;  %v3569_v18 = vld [vmem:[%s4776_s2 + $0x40] ss:$8 sps:$4 sm:$0xff]   ;;  %v3570_v20 = vld [vmem:[%s4776_s2 + $0x54] ss:$8 sps:$4 sm:$0xff]  }
  0x87   : > { %v3547_v2 = vld [vmem:[%s4315_s26] sm:$0xff]   ;;  %v3548_v3 = vld [vmem:[%s4315_s26 + $0x8] sm:$0xff]   ;;  %v3549_v4 = vld [vmem:[%s4315_s26 + $0x10] sm:$0xff]   ;;  %v4469_v57 = vsub.s32 0, %v4463_v54  ;;  %vm2336_vm3 = vcmask 1042434   ;;  %vm2338_vm4 = vcmask 1043459  }
  0x88   : > { %3447 = vmatprep.mubr.msk.bf16.mxu0 %vm508_vm1, %v3547_v2  ;;  %v3550_v5 = vld [vmem:[%s4315_s26 + $0x18] sm:$0xff]   ;;  %v3551_v8 = vld [vmem:[%s4315_s26 + $0x20] sm:$0xff]   ;;  %v3552_v13 = vld [vmem:[%s4315_s26 + $0x28] sm:$0xff]   ;;  %773 = vmatpush1.bf16.msra.mxu1 %v3560_v10  ;;  %vm2340_vm5 = vcmask 1044484   ;;  %vm2342_vm6 = vcmask 1045509   ;;  %vm2344_vm7 = vcmask 1046534  }
  0x89   : > { %3448 = vmatmul.mubr.msk.bf16.vlgmr.msra.gmra.mrb[0].mxu0 %vm508_vm1, %v3548_v3  ;;  %v3553_v15 = vld [vmem:[%s4315_s26 + $0x30] sm:$0xff]   ;;  %774 = vmatprep.subr.bf16.mxu1 %v3561_v11  ;;  %v3554_v19 = vld [vmem:[%s4315_s26 + $0x38] sm:$0xff]   ;;  %v3573_v22 = vld [vmem:[%s4776_s2 + $0x64] ss:$8 sps:$4 sm:$0xff]   ;;  %vm2346_vm8 = vcmask 1047559   ;;  %s439_s14 = sand.u32 1, %s4051_s18  }
  0x8a   : > { %3451 = vmatprep.mubr.msk.bf16.mxu0 %vm508_vm1, %v3549_v4  ;;  %v3572_v21 = vld [vmem:[%s4776_s2 + $0x50] ss:$8 sps:$4 sm:$0xff]   ;;  %v3575_v23 = vld [vmem:[%s4776_s2 + $0x60] ss:$8 sps:$4 sm:$0xff]   ;;  %v3576_v24 = vld [vmem:[%s4776_s2 + $0x74] ss:$8 sps:$4 sm:$0xff]  }
  0x8b   : > { %v3578_v25 = vld [vmem:[%s4776_s2 + $0x70] ss:$8 sps:$4 sm:$0xff]   ;;  %v3579_v27 = vld [vmem:[%s4777_s3] ss:$8 sps:$4 sm:$0xff]   ;;  %v3581_v28 = vld [vmem:[%s4777_s3 + $0x4] ss:$8 sps:$4 sm:$0xff]  }
  0x8c   : > { %775 = vmatpush1.bf16.msra.mxu1 %v3563_v12  ;;  %v3584_v29 = vld [vmem:[%s4777_s3 + $0x14] ss:$8 sps:$4 sm:$0xff]   ;;  %1161 = vmatprep.subr.bf16.mxu0 %v3581_v28  ;;  %v3582_v30 = vld [vmem:[%s4777_s3 + $0x10] ss:$8 sps:$4 sm:$0xff]   ;;  %v3587_v31 = vld [vmem:[%s4777_s3 + $0x24] ss:$8 sps:$4 sm:$0xff]  }
  0x8d   : > { %776 = vmatprep.subr.bf16.mxu1 %v3564_v14  ;;  %1162 = vmatpush1.bf16.msra.mxu0 %v3579_v27  ;;  %v3585_v32 = vld [vmem:[%s4777_s3 + $0x20] ss:$8 sps:$4 sm:$0xff]   ;;  %v3590_v33 = vld [vmem:[%s4777_s3 + $0x34] ss:$8 sps:$4 sm:$0xff]   ;;  %v3588_v34 = vld [vmem:[%s4777_s3 + $0x30] ss:$8 sps:$4 sm:$0xff]  }
  0x8e   : > { %1163 = vmatprep.subr.bf16.mxu0 %v3584_v29  ;;  %v3593_v35 = vld [vmem:[%s4777_s3 + $0x44] ss:$8 sps:$4 sm:$0xff]   ;;  %v3591_v36 = vld [vmem:[%s4777_s3 + $0x40] ss:$8 sps:$4 sm:$0xff]   ;;  %v3596_v37 = vld [vmem:[%s4777_s3 + $0x54] ss:$8 sps:$4 sm:$0xff]  }
  0x8f   : > { %v3594_v38 = vld [vmem:[%s4777_s3 + $0x50] ss:$8 sps:$4 sm:$0xff]   ;;  %v3599_v39 = vld [vmem:[%s4777_s3 + $0x64] ss:$8 sps:$4 sm:$0xff]   ;;  %v3597_v40 = vld [vmem:[%s4777_s3 + $0x60] ss:$8 sps:$4 sm:$0xff]  }
  0x90   : > { %777 = vmatpush1.bf16.msra.mxu1 %v3566_v16  ;;  %v3602_v41 = vld [vmem:[%s4777_s3 + $0x74] ss:$8 sps:$4 sm:$0xff]   ;;  %v3600_v42 = vld [vmem:[%s4777_s3 + $0x70] ss:$8 sps:$4 sm:$0xff]   ;;  %v3605_v43 = vld [vmem:[%s4777_s3 + $0x84] ss:$8 sps:$4 sm:$0xff]  }
  0x91   : > { %3452 = vmatmul.mubr.msk.bf16.gmra.mrb[4].mxu0 %vm508_vm1, %v3550_v5  ;;  %778 = vmatprep.subr.bf16.mxu1 %v3567_v17  ;;  %v3603_v44 = vld [vmem:[%s4777_s3 + $0x80] ss:$8 sps:$4 sm:$0xff]   ;;  %v3608_v45 = vld [vmem:[%s4777_s3 + $0x94] ss:$8 sps:$4 sm:$0xff]   ;;  %v3606_v46 = vld [vmem:[%s4777_s3 + $0x90] ss:$8 sps:$4 sm:$0xff]  }
  0x92   : > { %3455 = vmatprep.mubr.msk.bf16.mxu0 %vm508_vm1, %v3551_v8  ;;  %1164 = vmatpush1.bf16.msra.mxu0 %v3582_v30  ;;  %v3611_v47 = vld [vmem:[%s4777_s3 + $0xa4] ss:$8 sps:$4 sm:$0xff]   ;;  %v3609_v48 = vld [vmem:[%s4777_s3 + $0xa0] ss:$8 sps:$4 sm:$0xff]   ;;  %v3614_v49 = vld [vmem:[%s4777_s3 + $0xb4] ss:$8 sps:$4 sm:$0xff]  }
  0x93   : > { %1165 = vmatprep.subr.bf16.mxu0 %v3587_v31  ;;  %v3612_v50 = vld [vmem:[%s4777_s3 + $0xb0] ss:$8 sps:$4 sm:$0xff]   ;;  %v3617_v51 = vld [vmem:[%s4777_s3 + $0xc4] ss:$8 sps:$4 sm:$0xff]   ;;  %v3615_v52 = vld [vmem:[%s4777_s3 + $0xc0] ss:$8 sps:$4 sm:$0xff]  }
  0x94   : > { %779 = vmatpush1.bf16.msra.mxu1 %v3569_v18  ;;  %v642_v55 = vld [vmem:[%s4783_s9] sm:$0x1]  ;;  %v3637_v53 = vld [vmem:[%s4778_s4 + $0x24] ss:$8 sps:$4 sm:$0xff]   ;;  %s3193_s16 = sshll.u32 %s439_s14, 4  ;;  %s3435_s22 = sshll.u32 %s4150_s21, 8 }
  0x95   : > { %780 = vmatprep.subr.bf16.mxu1 %v3570_v20  ;;  %v644_v56 = vpack.i.b16 %v642_v55, %v642_v55  ;;  %v3635_v55 = vld [vmem:[%s4778_s4 + $0x20] ss:$8 sps:$4 sm:$0xff]   ;;  %s441_s15 = scalar_lea.vmem [#allocation10], %s3193_s16  ;;  %s4815_s29 = sld [smem:[#allocation21_spill]] }
  0x96   : > { %1166 = vmatpush1.bf16.msra.mxu0 %v3585_v32  ;;  %s3081_s11 = sshll.u32 %s441_s15, 4  ;;  %s3067_s21 = scalar_lea.sflag [#allocation4], %s439_s14  ;;  %s4734_s11 = int_to_ptr.vmem [resolvable:$true] %s3081_s11 }
  0x97   : > { %1167 = vmatprep.subr.bf16.mxu0 %v3590_v33  ;;  %v649_v61 = vrot.slane %v644_v56, %v4469_v57  ;;  %v3640_v56 = vld [vmem:[%s4778_s4 + $0x34] ss:$8 sps:$4 sm:$0xff]   ;;  %s3985_s24 = scalar_lea.vmem %s4734_s11, 256  ;;  %p4816_p11 = scmp.ne.s32.totalorder %s4802_s27, 0 }
  0x98   : > { %781 = vmatpush1.bf16.msra.mxu1 %v3572_v21  ;;  %p3986_p8 = scmp.ne.s32.totalorder %s4734_s11, %s3985_s24  ;;  %s4068_s17 = smov [#allocation10]  }
  0x99   : > { %3456 = vmatmul.mubr.msk.bf16.gmra.mrb[8].mxu0 %vm508_vm1, %v3552_v13  ;;  %782 = vmatprep.subr.bf16.mxu1 %v3573_v22  ;;  %s3989_s20 = sshll.u32 %s4068_s17, 4  ;;  %s3990_s20 = int_to_ptr.vmem [resolvable:$false] %s3989_s20 }
  0x9a   : > { %3459 = vmatprep.mubr.msk.bf16.mxu0 %vm508_vm1, %v3553_v15  ;;  %1168 = vmatpush1.bf16.msra.mxu0 %v3588_v34  ;;  %p3987_p13 = pnand %p3986_p8, %p4816_p11  ;;  %s3991_s28 = scalar_lea.vmem %s3990_s20, 512 }
  0x9b   : > { %1169 = vmatprep.subr.bf16.mxu0 %v3593_v35  ;;  %s4732_s13 = scalar_lea.hbm %s4815_s29, %s3435_s22  ;;  %p3992_p6 = scmp.lt.s32.totalorder %s4734_s11, %s3990_s20 }
  0x9c   : > { %783 = vmatpush1.bf16.msra.mxu1 %v3575_v23  ;;  %p3988_p1 = pneg %p3987_p13  ;;  %p3993_p9 = scmp.lt.s32.totalorder %s3991_s28, %s3985_s24 }
  0x9d   : > { %784 = vmatprep.subr.bf16.mxu1 %v3576_v24 }
  0x9e   : > { %1170 = vmatpush1.bf16.msra.mxu0 %v3591_v36  ;;  %p3994_p5 = por %p3993_p9, %p3992_p6 }
  0x9f   : > { %1171 = vmatprep.subr.bf16.mxu0 %v3596_v37 }
  0xa0   : > { %785 = vmatpush1.bf16.msra.mxu1 %v3578_v25  ;;  %p3995_p0 = pnand %p3994_p5, %p3988_p1 }
  0xa1   : > { %3460 = vmatmul.mubr.msk.bf16.gmra.mrb[12].mxu0 %vm508_vm1, %v3554_v19 }
  0xa2   : > { %1172 = vmatpush1.bf16.msra.mxu0 %v3594_v38 }
  0xa3   : > { %1173 = vmatprep.subr.bf16.mxu0 %v3599_v39 }
  0xa6   : > { %1174 = vmatpush1.bf16.msra.mxu0 %v3597_v40 }
  0xa7   : > { %1175 = vmatprep.subr.bf16.mxu0 %v3602_v41 }
  0xaa   : > { %1176 = vmatpush1.bf16.msra.mxu0 %v3600_v42 }
  0xab   : > { %1177 = vmatprep.subr.bf16.mxu0 %v3605_v43 }
  0xae   : > { %1178 = vmatpush1.bf16.msra.mxu0 %v3603_v44  ;;  %v3620_v44 = vld [vmem:[%s4777_s3 + $0xd4] ss:$8 sps:$4 sm:$0xff]  }
  0xaf   : > { %1179 = vmatprep.subr.bf16.mxu0 %v3608_v45  ;;  %v3618_v45 = vld [vmem:[%s4777_s3 + $0xd0] ss:$8 sps:$4 sm:$0xff]  }
  0xb2   : > { %1180 = vmatpush1.bf16.msra.mxu0 %v3606_v46  ;;  %v3625_v46 = vld [vmem:[%s4777_s3 + $0xe4] ss:$8 sps:$4 sm:$0xff]  }
  0xb3   : > { %1181 = vmatprep.subr.bf16.mxu0 %v3611_v47  ;;  %v3628_v47 = vld [vmem:[%s4777_s3 + $0xf4] ss:$8 sps:$4 sm:$0xff]  }
  0xb6   : > { %1182 = vmatpush1.bf16.msra.mxu0 %v3609_v48  ;;  %v3626_v48 = vld [vmem:[%s4777_s3 + $0xf0] ss:$8 sps:$4 sm:$0xff]  }
  0xb7   : > { %1183 = vmatprep.subr.bf16.mxu0 %v3614_v49  ;;  %v3629_v49 = vld [vmem:[%s4778_s4] ss:$8 sps:$4 sm:$0xff]  }
  0xba   : > { %1184 = vmatpush1.bf16.msra.mxu0 %v3612_v50  ;;  %v3631_v50 = vld [vmem:[%s4778_s4 + $0x4] ss:$8 sps:$4 sm:$0xff]  }
  0xbb   : > { %1185 = vmatprep.subr.bf16.mxu0 %v3617_v51  ;;  %v3634_v51 = vld [vmem:[%s4778_s4 + $0x14] ss:$8 sps:$4 sm:$0xff]   ;;  %1550 = vmatprep.subr.bf16.mxu1 %v3631_v50 }
  0xbe   : > { %1186 = vmatpush1.bf16.msra.mxu0 %v3615_v52  ;;  %v3632_v52 = vld [vmem:[%s4778_s4 + $0x10] ss:$8 sps:$4 sm:$0xff]  }
  0xbf   : > { %1187 = vmatprep.subr.bf16.mxu0 %v3620_v44 }
  0xc2   : > { %1188 = vmatpush1.bf16.msra.mxu0 %v3618_v45 }
  0xc3   : > { %1189 = vmatprep.subr.bf16.mxu0 %v3625_v46 }
 0x15c   : > { %v3449_v58 = vpop.f32.mrb[0].mxu0 }
 0x15d   : > { %v571_v59 = vpop.f32.mrb[1].mxu0 }
 0x15e   : > { %v3450_v60 = vpop.f32.mrb[2].mxu0 }
 0x15f   : > { %v635_v62 = vpack.c.bf16 %v3450_v60, %v3449_v58  ;;  %v574_v63 = vpop.f32.mrb[3].mxu0  ;;  %v3638_v58 = vld [vmem:[%s4778_s4 + $0x30] ss:$8 sps:$4 sm:$0xff]   ;;  %v3641_v60 = vld [vmem:[%s4778_s4 + $0x40] ss:$8 sps:$4 sm:$0xff]  }
 0x160   : > { %v634_v0 = vpack.c.bf16 %v574_v63, %v571_v59  ;;  %v3643_v59 = vld [vmem:[%s4778_s4 + $0x44] ss:$8 sps:$4 sm:$0xff]  }
 0x161   : > { %v651_v5 = vadd.bf16 %v649_v61, %v635_v62  ;;  %v3644_v62 = vld [vmem:[%s4778_s4 + $0x50] ss:$8 sps:$4 sm:$0xff]   ;;  %v3649_v63 = vld [vmem:[%s4778_s4 + $0x64] ss:$8 sps:$4 sm:$0xff]  }
 0x162   : > { %v650_v1 = vadd.bf16 %v649_v61, %v634_v0  ;;  %v3647_v0 = vld [vmem:[%s4778_s4 + $0x60] ss:$8 sps:$4 sm:$0xff]  }
 0x163   : > { %v659_v11 = vmul.bf16 1009007652, %v651_v5 }
 0x164   : > { %v658_v2 = vmul.bf16 1009007652, %v650_v1  ;;  %v3453_v3 = vpop.f32.mrb[4].mxu0 }
 0x165   : > { %v587_v4 = vpop.f32.mrb[5].mxu0  ;;  %v667_v15 = vmax.bf16 %v659_v11, %v651_v5  ;;  %v3658_v5 = vld [vmem:[%s4778_s4 + $0x94] ss:$8 sps:$4 sm:$0xff]   ;;  %v3667_v11 = vld [vmem:[%s4778_s4 + $0xc4] ss:$8 sps:$4 sm:$0xff]  }
 0x166   : > { %v666_v6 = vmax.bf16 %v658_v2, %v650_v1  ;;  %v3454_v7 = vpop.f32.mrb[6].mxu0  ;;  %v3652_v1 = vld [vmem:[%s4778_s4 + $0x74] ss:$8 sps:$4 sm:$0xff]   ;;  %v3650_v2 = vld [vmem:[%s4778_s4 + $0x70] ss:$8 sps:$4 sm:$0xff]  }
 0x167   : > { %v637_v8 = vpack.c.bf16 %v3454_v7, %v3453_v3  ;;  %v590_v9 = vpop.f32.mrb[7].mxu0  ;;  %v3655_v3 = vld [vmem:[%s4778_s4 + $0x84] ss:$8 sps:$4 sm:$0xff]  }
 0x168   : > { %803 = vmatmul.mubr.bf16.vlgmr.msra.gmra.mrb[0].mxu1 %v666_v6  ;;  %v636_v10 = vpack.c.bf16 %v590_v9, %v587_v4  ;;  %v3653_v4 = vld [vmem:[%s4778_s4 + $0x80] ss:$8 sps:$4 sm:$0xff]   ;;  %v3656_v6 = vld [vmem:[%s4778_s4 + $0x90] ss:$8 sps:$4 sm:$0xff]   ;;  %v3661_v7 = vld [vmem:[%s4778_s4 + $0xa4] ss:$8 sps:$4 sm:$0xff]  }
 0x169   : > { %812 = vmatprep.mubr.bf16.mxu1 %v4067_v26  ;;  %v653_v23 = vadd.bf16 %v649_v61, %v637_v8  ;;  %1551 = vmatpush1.bf16.msra.mxu1 %v3629_v49  ;;  %v3659_v8 = vld [vmem:[%s4778_s4 + $0xa0] ss:$8 sps:$4 sm:$0xff]   ;;  %v3664_v9 = vld [vmem:[%s4778_s4 + $0xb4] ss:$8 sps:$4 sm:$0xff]  }
 0x16a   : > { %v652_v14 = vadd.bf16 %v649_v61, %v636_v10  ;;  %1552 = vmatprep.subr.bf16.mxu1 %v3634_v51  ;;  %v3662_v10 = vld [vmem:[%s4778_s4 + $0xb0] ss:$8 sps:$4 sm:$0xff]  }
 0x16b   : > { %v661_v30 = vmul.bf16 1009007652, %v653_v23 }
 0x16c   : > { %v3457_v12 = vpop.f32.mrb[8].mxu0  ;;  %v660_v20 = vmul.bf16 1009007652, %v652_v14 }
 0x16d   : > { %v603_v13 = vpop.f32.mrb[9].mxu0  ;;  %v669_v32 = vmax.bf16 %v661_v30, %v653_v23  ;;  %1553 = vmatpush1.bf16.msra.mxu1 %v3632_v52 }
 0x16e   : > { %v3458_v16 = vpop.f32.mrb[10].mxu0  ;;  %v668_v24 = vmax.bf16 %v660_v20, %v652_v14  ;;  %1554 = vmatprep.subr.bf16.mxu1 %v3637_v53 }
 0x16f   : > { %v639_v17 = vpack.c.bf16 %v3458_v16, %v3457_v12  ;;  %v606_v18 = vpop.f32.mrb[11].mxu0  ;;  %v899_v12 = vld [vmem:[%s4783_s9] sm:$0x11] }
 0x170   : > { %813 = vmatmul.mubr.bf16.gmra.mrb[4].mxu1 %v667_v15  ;;  %v638_v19 = vpack.c.bf16 %v606_v18, %v603_v13  ;;  %v3665_v13 = vld [vmem:[%s4778_s4 + $0xc0] ss:$8 sps:$4 sm:$0xff]   ;;  %v3229_v14 = vcombine.low %v899_v12, %v899_v12  ;;  %v3230_v15 = vcombine.high %v899_v12, %v899_v12 }
 0x171   : > { %822 = vmatprep.mubr.bf16.mxu1 %v4067_v26  ;;  %v655_v34 = vadd.bf16 %v649_v61, %v639_v17  ;;  %1555 = vmatpush1.bf16.msra.mxu1 %v3635_v55 }
 0x172   : > { %v654_v31 = vadd.bf16 %v649_v61, %v638_v19  ;;  %1556 = vmatprep.subr.bf16.mxu1 %v3640_v56  ;;  %v906_v16 = vshrl.u32 %v3229_v14, 16  ;;  %v914_v17 = vshrl.u32 %v3230_v15, 16 }
 0x173   : > { %v663_v36 = vmul.bf16 1009007652, %v655_v34 }
 0x174   : > { %v3461_v21 = vpop.f32.mrb[12].mxu0  ;;  %v662_v33 = vmul.bf16 1009007652, %v654_v31  ;;  %v907_v18 = vpack.i.b16 %v906_v16, %v906_v16  ;;  %v915_v19 = vpack.i.b16 %v914_v17, %v914_v17 }
 0x175   : > { %v619_v22 = vpop.f32.mrb[13].mxu0  ;;  %v671_v38 = vmax.bf16 %v663_v36, %v655_v34  ;;  %1557 = vmatpush1.bf16.msra.mxu1 %v3638_v58 }
 0x176   : > { %v3462_v25 = vpop.f32.mrb[14].mxu0  ;;  %v670_v35 = vmax.bf16 %v662_v33, %v654_v31  ;;  %1558 = vmatprep.subr.bf16.mxu1 %v3643_v59 }
 0x177   : > { %v641_v27 = vpack.c.bf16 %v3462_v25, %v3461_v21  ;;  %v622_v28 = vpop.f32.mrb[15].mxu0 }
 0x178   : > { %823 = vmatmul.mubr.bf16.gmra.mrb[8].mxu1 %v668_v24  ;;  %v640_v29 = vpack.c.bf16 %v622_v28, %v619_v22  ;;  %v4579_v22 = vrot.slane %v907_v18, %v4469_v57  ;;  %v4582_v24 = vrot.slane %v915_v19, %v4469_v57 }
 0x179   : > { %832 = vmatprep.mubr.bf16.mxu1 %v4067_v26  ;;  %v657_v40 = vadd.bf16 %v649_v61, %v641_v27  ;;  %1559 = vmatpush1.bf16.msra.mxu1 %v3641_v60 }
 0x17a   : > { %v656_v37 = vadd.bf16 %v649_v61, %v640_v29  ;;  %v3646_v61 = vld [vmem:[%s4778_s4 + $0x54] ss:$8 sps:$4 sm:$0xff]  }
 0x17b   : > { %v665_v42 = vmul.bf16 1009007652, %v657_v40  ;;  %1560 = vmatprep.subr.bf16.mxu1 %v3646_v61 }
 0x17c   : > { %v664_v39 = vmul.bf16 1009007652, %v656_v37 }
 0x17d   : > { %v673_v43 = vmax.bf16 %v665_v42, %v657_v40  ;;  %1561 = vmatpush1.bf16.msra.mxu1 %v3644_v62 }
 0x17e   : > { %v672_v41 = vmax.bf16 %v664_v39, %v656_v37  ;;  %1562 = vmatprep.subr.bf16.mxu1 %v3649_v63 }
 0x180   : > { %833 = vmatmul.mubr.bf16.gmra.mrb[12].mxu1 %v669_v32 }
 0x181   : > { %842 = vmatprep.mubr.bf16.mxu1 %v4067_v26  ;;  %1563 = vmatpush1.bf16.msra.mxu1 %v3647_v0 }
 0x182   : > { %1564 = vmatprep.subr.bf16.mxu1 %v3652_v1 }
 0x185   : > { %1565 = vmatpush1.bf16.msra.mxu1 %v3650_v2 }
 0x186   : > { %1566 = vmatprep.subr.bf16.mxu1 %v3655_v3 }
 0x188   : > { %843 = vmatmul.mubr.bf16.gmra.mrb[16].mxu1 %v670_v35 }
 0x189   : > { %852 = vmatprep.mubr.bf16.mxu1 %v4067_v26  ;;  %1567 = vmatpush1.bf16.msra.mxu1 %v3653_v4 }
 0x18a   : > { %1568 = vmatprep.subr.bf16.mxu1 %v3658_v5 }
 0x18d   : > { %1569 = vmatpush1.bf16.msra.mxu1 %v3656_v6 }
 0x18e   : > { %1570 = vmatprep.subr.bf16.mxu1 %v3661_v7 }
 0x190   : > { %853 = vmatmul.mubr.bf16.gmra.mrb[20].mxu1 %v671_v38 }
 0x191   : > { %862 = vmatprep.mubr.bf16.mxu1 %v4067_v26  ;;  %1571 = vmatpush1.bf16.msra.mxu1 %v3659_v8 }
 0x192   : > { %1572 = vmatprep.subr.bf16.mxu1 %v3664_v9 }
 0x195   : > { %1573 = vmatpush1.bf16.msra.mxu1 %v3662_v10 }
 0x196   : > { %1574 = vmatprep.subr.bf16.mxu1 %v3667_v11 }
 0x198   : > { %863 = vmatmul.mubr.bf16.gmra.mrb[24].mxu1 %v672_v41 }
 0x199   : > { %872 = vmatprep.mubr.bf16.mxu1 %v4067_v26  ;;  %v3623_v26 = vld [vmem:[%s4777_s3 + $0xe0] ss:$8 sps:$4 sm:$0xff]   ;;  %1575 = vmatpush1.bf16.msra.mxu1 %v3665_v13 }
 0x19a   : > { %1190 = vmatpush1.bf16.msra.mxu0 %v3623_v26 }
 0x19b   : > { %1191 = vmatprep.subr.bf16.mxu0 %v3628_v47 }
 0x19e   : > { %1192 = vmatpush1.bf16.msra.mxu0 %v3626_v48 }
 0x1a0   : > { %873 = vmatmul.mubr.bf16.gmra.mrb[28].mxu1 %v673_v43 }
 0x23b   : > { %v804_v20 = vpop.f32.mrb[0].mxu1 }
 0x23c   : > { %v806_v21 = vpop.f32.mrb[1].mxu1 }
 0x23d   : > { %v808_v23 = vpop.f32.mrb[2].mxu1 }
 0x23e   : > { %v883_v25 = vpack.c.bf16 %v808_v23, %v804_v20  ;;  %v810_v27 = vpop.f32.mrb[3].mxu1 }
 0x23f   : > { %v884_v28 = vpack.c.bf16 %v810_v27, %v806_v21 }
 0x240   : > { %v921_v29 = vadd.bf16 %v4579_v22, %v883_v25 }
 0x241   : > { %v922_v30 = vadd.bf16 %v4582_v24, %v884_v28 }
 0x242   : > { %v937_v31 = vmul.bf16 1009007652, %v921_v29 }
 0x243   : > { %v938_v32 = vmul.bf16 1009007652, %v922_v30  ;;  %v814_v33 = vpop.f32.mrb[4].mxu1 }
 0x244   : > { %v816_v34 = vpop.f32.mrb[5].mxu1  ;;  %v953_v37 = vmax.bf16 %v937_v31, %v921_v29 }
 0x245   : > { %v818_v35 = vpop.f32.mrb[6].mxu1  ;;  %v954_v36 = vmax.bf16 %v938_v32, %v922_v30 }
 0x246   : > { %v885_v38 = vpack.c.bf16 %v818_v35, %v814_v33  ;;  %v820_v39 = vpop.f32.mrb[7].mxu1 }
 0x247   : > { %v886_v40 = vpack.c.bf16 %v820_v39, %v816_v34  ;;  %1193 = vmatprep.mubr.bf16.mxu0 %v954_v36 }
 0x248   : > { %v923_v41 = vadd.bf16 %v4579_v22, %v885_v38  ;;  %1194 = vmatmul.mubr.bf16.vlgmr.msra.gmra.mrb[16].mxu0 %v953_v37 }
 0x249   : > { %v924_v42 = vadd.bf16 %v4582_v24, %v886_v40 }
 0x24a   : > { %v939_v43 = vmul.bf16 1009007652, %v923_v41 }
 0x24b   : > { %v940_v44 = vmul.bf16 1009007652, %v924_v42  ;;  %v824_v45 = vpop.f32.mrb[8].mxu1 }
 0x24c   : > { %v826_v46 = vpop.f32.mrb[9].mxu1  ;;  %v955_v50 = vmax.bf16 %v939_v43, %v923_v41 }
 0x24d   : > { %v828_v26 = vpop.f32.mrb[10].mxu1  ;;  %v956_v47 = vmax.bf16 %v940_v44, %v924_v42 }
 0x24e   : > { %v887_v48 = vpack.c.bf16 %v828_v26, %v824_v45  ;;  %v830_v49 = vpop.f32.mrb[11].mxu1 }
 0x24f   : > { %v888_v51 = vpack.c.bf16 %v830_v49, %v826_v46  ;;  %1203 = vmatprep.mubr.bf16.mxu0 %v956_v47 }
 0x250   : > { %v925_v52 = vadd.bf16 %v4579_v22, %v887_v48  ;;  %1204 = vmatmul.mubr.bf16.gmra.mrb[20].mxu0 %v955_v50 }
 0x251   : > { %v926_v53 = vadd.bf16 %v4582_v24, %v888_v51 }
 0x252   : > { %v941_v55 = vmul.bf16 1009007652, %v925_v52 }
 0x253   : > { %v942_v56 = vmul.bf16 1009007652, %v926_v53  ;;  %v834_v58 = vpop.f32.mrb[12].mxu1 }
 0x254   : > { %v836_v59 = vpop.f32.mrb[13].mxu1  ;;  %v957_v0 = vmax.bf16 %v941_v55, %v925_v52 }
 0x255   : > { %v838_v60 = vpop.f32.mrb[14].mxu1  ;;  %v958_v61 = vmax.bf16 %v942_v56, %v926_v53 }
 0x256   : > { %v889_v62 = vpack.c.bf16 %v838_v60, %v834_v58  ;;  %v840_v63 = vpop.f32.mrb[15].mxu1  ;;  %v3670_v60 = vld [vmem:[%s4778_s4 + $0xd4] ss:$8 sps:$4 sm:$0xff]  }
 0x257   : > { %v890_v1 = vpack.c.bf16 %v840_v63, %v836_v59  ;;  %1213 = vmatprep.mubr.bf16.mxu0 %v958_v61  ;;  %v3668_v61 = vld [vmem:[%s4778_s4 + $0xd0] ss:$8 sps:$4 sm:$0xff]   ;;  %1576 = vmatprep.subr.bf16.mxu1 %v3670_v60 }
 0x258   : > { %v927_v2 = vadd.bf16 %v4579_v22, %v889_v62  ;;  %1214 = vmatmul.mubr.bf16.gmra.mrb[24].mxu0 %v957_v0  ;;  %1577 = vmatpush1.bf16.msra.mxu1 %v3668_v61  ;;  %v3678_v62 = vld [vmem:[%s4778_s4 + $0xf4] ss:$8 sps:$4 sm:$0xff]   ;;  %v3676_v63 = vld [vmem:[%s4778_s4 + $0xf0] ss:$8 sps:$4 sm:$0xff]   ;;  %v3679_v0 = vld [vmem:[#allocation2] ss:$8 sps:$4 sm:$0xff]  }
 0x259   : > { %v928_v3 = vadd.bf16 %v4582_v24, %v890_v1  ;;  %v3681_v1 = vld [vmem:[#allocation2 + $0x4] ss:$8 sps:$4 sm:$0xff]  }
 0x25a   : > { %v943_v4 = vmul.bf16 1009007652, %v927_v2  ;;  %1933 = vmatprep.subr.bf16.mxu0 %v3681_v1 }
 0x25b   : > { %v944_v5 = vmul.bf16 1009007652, %v928_v3  ;;  %v844_v6 = vpop.f32.mrb[16].mxu1  ;;  %1934 = vmatpush1.bf16.msra.mxu0 %v3679_v0 }
 0x25c   : > { %v846_v7 = vpop.f32.mrb[17].mxu1  ;;  %v959_v12 = vmax.bf16 %v943_v4, %v927_v2  ;;  %v3684_v2 = vld [vmem:[#allocation2 + $0x14] ss:$8 sps:$4 sm:$0xff]   ;;  %v3687_v4 = vld [vmem:[#allocation2 + $0x24] ss:$8 sps:$4 sm:$0xff]  }
 0x25d   : > { %v848_v8 = vpop.f32.mrb[18].mxu1  ;;  %v960_v9 = vmax.bf16 %v944_v5, %v928_v3  ;;  %v3682_v3 = vld [vmem:[#allocation2 + $0x10] ss:$8 sps:$4 sm:$0xff]   ;;  %1935 = vmatprep.subr.bf16.mxu0 %v3684_v2  ;;  %v3685_v5 = vld [vmem:[#allocation2 + $0x20] ss:$8 sps:$4 sm:$0xff]  }
 0x25e   : > { %v891_v10 = vpack.c.bf16 %v848_v8, %v844_v6  ;;  %v850_v11 = vpop.f32.mrb[19].mxu1  ;;  %v3690_v6 = vld [vmem:[#allocation2 + $0x34] ss:$8 sps:$4 sm:$0xff]   ;;  %v3693_v8 = vld [vmem:[#allocation2 + $0x44] ss:$8 sps:$4 sm:$0xff]  }
 0x25f   : > { %v892_v13 = vpack.c.bf16 %v850_v11, %v846_v7  ;;  %1223 = vmatprep.mubr.bf16.mxu0 %v960_v9  ;;  %1936 = vmatpush1.bf16.msra.mxu0 %v3682_v3  ;;  %v3688_v7 = vld [vmem:[#allocation2 + $0x30] ss:$8 sps:$4 sm:$0xff]   ;;  %v3691_v9 = vld [vmem:[#allocation2 + $0x40] ss:$8 sps:$4 sm:$0xff]  }
 0x260   : > { %v929_v14 = vadd.bf16 %v4579_v22, %v891_v10  ;;  %1224 = vmatmul.mubr.bf16.gmra.mrb[28].mxu0 %v959_v12  ;;  %1937 = vmatprep.subr.bf16.mxu0 %v3687_v4  ;;  %v3696_v10 = vld [vmem:[#allocation2 + $0x54] ss:$8 sps:$4 sm:$0xff]   ;;  %v3694_v11 = vld [vmem:[#allocation2 + $0x50] ss:$8 sps:$4 sm:$0xff]   ;;  %v3699_v12 = vld [vmem:[#allocation2 + $0x64] ss:$8 sps:$4 sm:$0xff]  }
 0x261   : > { %v930_v15 = vadd.bf16 %v4582_v24, %v892_v13  ;;  %v3697_v13 = vld [vmem:[#allocation2 + $0x60] ss:$8 sps:$4 sm:$0xff]  }
 0x262   : > { %v945_v16 = vmul.bf16 1009007652, %v929_v14 }
 0x263   : > { %v946_v17 = vmul.bf16 1009007652, %v930_v15  ;;  %v854_v18 = vpop.f32.mrb[20].mxu1  ;;  %1938 = vmatpush1.bf16.msra.mxu0 %v3685_v5 }
 0x264   : > { %v856_v19 = vpop.f32.mrb[21].mxu1  ;;  %v961_v27 = vmax.bf16 %v945_v16, %v929_v14  ;;  %1939 = vmatprep.subr.bf16.mxu0 %v3690_v6  ;;  %v3702_v14 = vld [vmem:[#allocation2 + $0x74] ss:$8 sps:$4 sm:$0xff]   ;;  %v3705_v16 = vld [vmem:[#allocation2 + $0x84] ss:$8 sps:$4 sm:$0xff]  }
 0x265   : > { %v858_v20 = vpop.f32.mrb[22].mxu1  ;;  %v962_v21 = vmax.bf16 %v946_v17, %v930_v15  ;;  %v3700_v15 = vld [vmem:[#allocation2 + $0x70] ss:$8 sps:$4 sm:$0xff]   ;;  %v3703_v17 = vld [vmem:[#allocation2 + $0x80] ss:$8 sps:$4 sm:$0xff]  }
 0x266   : > { %v893_v23 = vpack.c.bf16 %v858_v20, %v854_v18  ;;  %v860_v25 = vpop.f32.mrb[23].mxu1  ;;  %v3708_v18 = vld [vmem:[#allocation2 + $0x94] ss:$8 sps:$4 sm:$0xff]   ;;  %v3711_v20 = vld [vmem:[#allocation2 + $0xa4] ss:$8 sps:$4 sm:$0xff]  }
 0x267   : > { %v894_v28 = vpack.c.bf16 %v860_v25, %v856_v19  ;;  %1233 = vmatprep.mubr.bf16.mxu0 %v962_v21  ;;  %1940 = vmatpush1.bf16.msra.mxu0 %v3688_v7  ;;  %v3706_v19 = vld [vmem:[#allocation2 + $0x90] ss:$8 sps:$4 sm:$0xff]   ;;  %v3709_v21 = vld [vmem:[#allocation2 + $0xa0] ss:$8 sps:$4 sm:$0xff]  }
 0x268   : > { %v931_v29 = vadd.bf16 %v4579_v22, %v893_v23  ;;  %1234 = vmatmul.mubr.bf16.gmra.mrb[32].mxu0 %v961_v27  ;;  %1941 = vmatprep.subr.bf16.mxu0 %v3693_v8  ;;  %v3714_v23 = vld [vmem:[#allocation2 + $0xb4] ss:$8 sps:$4 sm:$0xff]   ;;  %v3712_v25 = vld [vmem:[#allocation2 + $0xb0] ss:$8 sps:$4 sm:$0xff]   ;;  %v3717_v27 = vld [vmem:[#allocation2 + $0xc4] ss:$8 sps:$4 sm:$0xff]  }
 0x269   : > { %v932_v30 = vadd.bf16 %v4582_v24, %v894_v28  ;;  %v3715_v28 = vld [vmem:[#allocation2 + $0xc0] ss:$8 sps:$4 sm:$0xff]  }
 0x26a   : > { %v947_v31 = vmul.bf16 1009007652, %v931_v29 }
 0x26b   : > { %v948_v32 = vmul.bf16 1009007652, %v932_v30  ;;  %v864_v33 = vpop.f32.mrb[24].mxu1  ;;  %1942 = vmatpush1.bf16.msra.mxu0 %v3691_v9 }
 0x26c   : > { %v866_v34 = vpop.f32.mrb[25].mxu1  ;;  %v963_v39 = vmax.bf16 %v947_v31, %v931_v29  ;;  %1943 = vmatprep.subr.bf16.mxu0 %v3696_v10  ;;  %v1290_v29 = vld [vmem:[%s4783_s9] sm:$0x22] }
 0x26d   : > { %v868_v35 = vpop.f32.mrb[26].mxu1  ;;  %v964_v36 = vmax.bf16 %v948_v32, %v932_v30  ;;  %v4621_v30 = vcombine.low %v1290_v29, %v1290_v29  ;;  %v4623_v31 = vcombine.high %v1290_v29, %v1290_v29 }
 0x26e   : > { %v895_v37 = vpack.c.bf16 %v868_v35, %v864_v33  ;;  %v870_v38 = vpop.f32.mrb[27].mxu1  ;;  %v4628_v33 = vsub.s32 1, %v4463_v54 }
 0x26f   : > { %v896_v40 = vpack.c.bf16 %v870_v38, %v866_v34  ;;  %1243 = vmatprep.mubr.bf16.mxu0 %v964_v36  ;;  %1944 = vmatpush1.bf16.msra.mxu0 %v3694_v11  ;;  %v1297_v32 = vpack.i.b16 %v4621_v30, %v4621_v30  ;;  %v1304_v34 = vpack.i.b16 %v4623_v31, %v4623_v31 }
 0x270   : > { %v933_v41 = vadd.bf16 %v4579_v22, %v895_v37  ;;  %1244 = vmatmul.mubr.bf16.gmra.mrb[36].mxu0 %v963_v39  ;;  %1945 = vmatprep.subr.bf16.mxu0 %v3699_v12 }
 0x271   : > { %v934_v42 = vadd.bf16 %v4582_v24, %v896_v40  ;;  %v4633_v37 = vrot.slane %v1297_v32, %v4628_v33  ;;  %v4636_v39 = vrot.slane %v1304_v34, %v4628_v33 }
 0x272   : > { %v949_v43 = vmul.bf16 1009007652, %v933_v41 }
 0x273   : > { %v950_v44 = vmul.bf16 1009007652, %v934_v42  ;;  %v874_v45 = vpop.f32.mrb[28].mxu1  ;;  %1946 = vmatpush1.bf16.msra.mxu0 %v3697_v13 }
 0x274   : > { %v876_v46 = vpop.f32.mrb[29].mxu1  ;;  %v965_v50 = vmax.bf16 %v949_v43, %v933_v41  ;;  %1947 = vmatprep.subr.bf16.mxu0 %v3702_v14 }
 0x275   : > { %v878_v26 = vpop.f32.mrb[30].mxu1  ;;  %v966_v47 = vmax.bf16 %v950_v44, %v934_v42 }
 0x276   : > { %v897_v48 = vpack.c.bf16 %v878_v26, %v874_v45  ;;  %v880_v49 = vpop.f32.mrb[31].mxu1 }
 0x277   : > { %v898_v51 = vpack.c.bf16 %v880_v49, %v876_v46  ;;  %1253 = vmatprep.mubr.bf16.mxu0 %v966_v47  ;;  %1948 = vmatpush1.bf16.msra.mxu0 %v3700_v15 }
 0x278   : > { %v935_v52 = vadd.bf16 %v4579_v22, %v897_v48  ;;  %1254 = vmatmul.mubr.bf16.gmra.mrb[40].mxu0 %v965_v50  ;;  %v3675_v22 = vld [vmem:[%s4778_s4 + $0xe4] ss:$8 sps:$4 sm:$0xff]   ;;  %1949 = vmatprep.subr.bf16.mxu0 %v3705_v16 }
 0x279   : > { %v936_v53 = vadd.bf16 %v4582_v24, %v898_v51  ;;  %v3673_v24 = vld [vmem:[%s4778_s4 + $0xe0] ss:$8 sps:$4 sm:$0xff]   ;;  %1578 = vmatprep.subr.bf16.mxu1 %v3675_v22 }
 0x27a   : > { %v951_v55 = vmul.bf16 1009007652, %v935_v52  ;;  %1579 = vmatpush1.bf16.msra.mxu1 %v3673_v24 }
 0x27b   : > { %v952_v56 = vmul.bf16 1009007652, %v936_v53  ;;  %1580 = vmatprep.subr.bf16.mxu1 %v3678_v62  ;;  %1950 = vmatpush1.bf16.msra.mxu0 %v3703_v17 }
 0x27c   : > { %v967_v59 = vmax.bf16 %v951_v55, %v935_v52  ;;  %1951 = vmatprep.subr.bf16.mxu0 %v3708_v18 }
 0x27d   : > { %v968_v58 = vmax.bf16 %v952_v56, %v936_v53 }
 0x27e   : > { %1581 = vmatpush1.bf16.msra.mxu1 %v3676_v63 }
 0x27f   : > { %1263 = vmatprep.mubr.bf16.mxu0 %v968_v58  ;;  %1952 = vmatpush1.bf16.msra.mxu0 %v3706_v19 }
 0x280   : > { %1264 = vmatmul.mubr.bf16.gmra.mrb[44].mxu0 %v967_v59  ;;  %1953 = vmatprep.subr.bf16.mxu0 %v3711_v20 }
 0x283   : > { %1954 = vmatpush1.bf16.msra.mxu0 %v3709_v21 }
 0x284   : > { %1955 = vmatprep.subr.bf16.mxu0 %v3714_v23 }
 0x287   : > { %1956 = vmatpush1.bf16.msra.mxu0 %v3712_v25 }
 0x288   : > { %1957 = vmatprep.subr.bf16.mxu0 %v3717_v27 }
 0x28b   : > { %1958 = vmatpush1.bf16.msra.mxu0 %v3715_v28 }
 0x31b   : > { %v1195_v35 = vpop.f32.mrb[16].mxu0 }
 0x31c   : > { %v1197_v36 = vpop.f32.mrb[17].mxu0 }
 0x31d   : > { %v1199_v38 = vpop.f32.mrb[18].mxu0 }
 0x31e   : > { %v1274_v40 = vpack.c.bf16 %v1199_v38, %v1195_v35  ;;  %v1201_v41 = vpop.f32.mrb[19].mxu0 }
 0x31f   : > { %v1275_v42 = vpack.c.bf16 %v1201_v41, %v1197_v36 }
 0x320   : > { %v1310_v43 = vadd.bf16 %v4633_v37, %v1274_v40 }
 0x321   : > { %v1311_v44 = vadd.bf16 %v4636_v39, %v1275_v42 }
 0x322   : > { %v1326_v45 = vmul.bf16 1009007652, %v1310_v43 }
 0x323   : > { %v1327_v46 = vmul.bf16 1009007652, %v1311_v44  ;;  %v1205_v26 = vpop.f32.mrb[20].mxu0 }
 0x324   : > { %v1207_v47 = vpop.f32.mrb[21].mxu0  ;;  %v1342_v50 = vmax.bf16 %v1326_v45, %v1310_v43 }
 0x325   : > { %v1209_v48 = vpop.f32.mrb[22].mxu0  ;;  %v1343_v49 = vmax.bf16 %v1327_v46, %v1311_v44 }
 0x326   : > { %v1276_v51 = vpack.c.bf16 %v1209_v48, %v1205_v26  ;;  %v1211_v52 = vpop.f32.mrb[23].mxu0 }
 0x327   : > { %v1277_v53 = vpack.c.bf16 %v1211_v52, %v1207_v47  ;;  %1582 = vmatprep.mubr.bf16.mxu1 %v1343_v49 }
 0x328   : > { %v1312_v55 = vadd.bf16 %v4633_v37, %v1276_v51  ;;  %1583 = vmatmul.mubr.bf16.vlgmr.msra.gmra.mrb[32].mxu1 %v1342_v50 }
 0x329   : > { %v1313_v56 = vadd.bf16 %v4636_v39, %v1277_v53 }
 0x32a   : > { %v1328_v58 = vmul.bf16 1009007652, %v1312_v55 }
 0x32b   : > { %v1329_v59 = vmul.bf16 1009007652, %v1313_v56  ;;  %v1215_v60 = vpop.f32.mrb[24].mxu0 }
 0x32c   : > { %v1217_v61 = vpop.f32.mrb[25].mxu0  ;;  %v1344_v0 = vmax.bf16 %v1328_v58, %v1312_v55 }
 0x32d   : > { %v1219_v22 = vpop.f32.mrb[26].mxu0  ;;  %v1345_v24 = vmax.bf16 %v1329_v59, %v1313_v56 }
 0x32e   : > { %v1278_v62 = vpack.c.bf16 %v1219_v22, %v1215_v60  ;;  %v1221_v63 = vpop.f32.mrb[27].mxu0 }
 0x32f   : > { %v1279_v1 = vpack.c.bf16 %v1221_v63, %v1217_v61  ;;  %1592 = vmatprep.mubr.bf16.mxu1 %v1345_v24 }
 0x330   : > { %v1314_v2 = vadd.bf16 %v4633_v37, %v1278_v62  ;;  %1593 = vmatmul.mubr.bf16.gmra.mrb[36].mxu1 %v1344_v0 }
 0x331   : > { %v1315_v3 = vadd.bf16 %v4636_v39, %v1279_v1 }
 0x332   : > { %v1330_v4 = vmul.bf16 1009007652, %v1314_v2 }
 0x333   : > { %v1331_v5 = vmul.bf16 1009007652, %v1315_v3  ;;  %v1225_v6 = vpop.f32.mrb[28].mxu0 }
 0x334   : > { %v1227_v7 = vpop.f32.mrb[29].mxu0  ;;  %v1346_v12 = vmax.bf16 %v1330_v4, %v1314_v2 }
 0x335   : > { %v1229_v8 = vpop.f32.mrb[30].mxu0  ;;  %v1347_v9 = vmax.bf16 %v1331_v5, %v1315_v3 }
 0x336   : > { %v1280_v10 = vpack.c.bf16 %v1229_v8, %v1225_v6  ;;  %v1231_v11 = vpop.f32.mrb[31].mxu0 }
 0x337   : > { %v1281_v13 = vpack.c.bf16 %v1231_v11, %v1227_v7  ;;  %1602 = vmatprep.mubr.bf16.mxu1 %v1347_v9  ;;  %v3720_v11 = vld [vmem:[#allocation2 + $0xd4] ss:$8 sps:$4 sm:$0xff]  }
 0x338   : > { %v1316_v14 = vadd.bf16 %v4633_v37, %v1280_v10  ;;  %1603 = vmatmul.mubr.bf16.gmra.mrb[40].mxu1 %v1346_v12  ;;  %v3718_v12 = vld [vmem:[#allocation2 + $0xd0] ss:$8 sps:$4 sm:$0xff]   ;;  %1959 = vmatprep.subr.bf16.mxu0 %v3720_v11 }
 0x339   : > { %v1317_v15 = vadd.bf16 %v4636_v39, %v1281_v13  ;;  %1960 = vmatpush1.bf16.msra.mxu0 %v3718_v12  ;;  %v3723_v13 = vld [vmem:[#allocation2 + $0xe4] ss:$8 sps:$4 sm:$0xff]  }
 0x33a   : > { %v1332_v16 = vmul.bf16 1009007652, %v1316_v14  ;;  %1961 = vmatprep.subr.bf16.mxu0 %v3723_v13 }
 0x33b   : > { %v1333_v17 = vmul.bf16 1009007652, %v1317_v15  ;;  %v1235_v18 = vpop.f32.mrb[32].mxu0 }
 0x33c   : > { %v1237_v19 = vpop.f32.mrb[33].mxu0  ;;  %v1348_v27 = vmax.bf16 %v1332_v16, %v1316_v14  ;;  %v3721_v14 = vld [vmem:[#allocation2 + $0xe0] ss:$8 sps:$4 sm:$0xff]   ;;  %v3724_v16 = vld [vmem:[#allocation2 + $0xf0] ss:$8 sps:$4 sm:$0xff]  }
 0x33d   : > { %v1239_v20 = vpop.f32.mrb[34].mxu0  ;;  %v1349_v21 = vmax.bf16 %v1333_v17, %v1317_v15  ;;  %1962 = vmatpush1.bf16.msra.mxu0 %v3721_v14  ;;  %v3726_v15 = vld [vmem:[#allocation2 + $0xf4] ss:$8 sps:$4 sm:$0xff]  }
 0x33e   : > { %v1282_v23 = vpack.c.bf16 %v1239_v20, %v1235_v18  ;;  %v1241_v25 = vpop.f32.mrb[35].mxu0  ;;  %1963 = vmatprep.subr.bf16.mxu0 %v3726_v15 }
 0x33f   : > { %v1283_v28 = vpack.c.bf16 %v1241_v25, %v1237_v19  ;;  %1612 = vmatprep.mubr.bf16.mxu1 %v1349_v21 }
 0x340   : > { %v1318_v29 = vadd.bf16 %v4633_v37, %v1282_v23  ;;  %1613 = vmatmul.mubr.bf16.gmra.mrb[44].mxu1 %v1348_v27 }
 0x341   : > { %v1319_v32 = vadd.bf16 %v4636_v39, %v1283_v28  ;;  %1964 = vmatpush1.bf16.msra.mxu0 %v3724_v16 }
 0x342   : > { %v1334_v34 = vmul.bf16 1009007652, %v1318_v29 }
 0x343   : > { %v1335_v35 = vmul.bf16 1009007652, %v1319_v32  ;;  %v1245_v36 = vpop.f32.mrb[36].mxu0 }
 0x344   : > { %v1247_v38 = vpop.f32.mrb[37].mxu0  ;;  %v1350_v44 = vmax.bf16 %v1334_v34, %v1318_v29 }
 0x345   : > { %v1249_v40 = vpop.f32.mrb[38].mxu0  ;;  %v1351_v41 = vmax.bf16 %v1335_v35, %v1319_v32 }
 0x346   : > { %v1284_v42 = vpack.c.bf16 %v1249_v40, %v1245_v36  ;;  %v1251_v43 = vpop.f32.mrb[39].mxu0 }
 0x347   : > { %v1285_v45 = vpack.c.bf16 %v1251_v43, %v1247_v38  ;;  %1622 = vmatprep.mubr.bf16.mxu1 %v1351_v41 }
 0x348   : > { %v1320_v46 = vadd.bf16 %v4633_v37, %v1284_v42  ;;  %1623 = vmatmul.mubr.bf16.gmra.mrb[48].mxu1 %v1350_v44 }
 0x349   : > { %v1321_v26 = vadd.bf16 %v4636_v39, %v1285_v45 }
 0x34a   : > { %v1336_v47 = vmul.bf16 1009007652, %v1320_v46 }
 0x34b   : > { %v1337_v48 = vmul.bf16 1009007652, %v1321_v26  ;;  %v1255_v49 = vpop.f32.mrb[40].mxu0 }
 0x34c   : > { %v1257_v50 = vpop.f32.mrb[41].mxu0  ;;  %v1352_v56 = vmax.bf16 %v1336_v47, %v1320_v46 }
 0x34d   : > { %v1259_v51 = vpop.f32.mrb[42].mxu0  ;;  %v1353_v52 = vmax.bf16 %v1337_v48, %v1321_v26 }
 0x34e   : > { %v1286_v53 = vpack.c.bf16 %v1259_v51, %v1255_v49  ;;  %v1261_v55 = vpop.f32.mrb[43].mxu0 }
 0x34f   : > { %v1287_v58 = vpack.c.bf16 %v1261_v55, %v1257_v50  ;;  %1632 = vmatprep.mubr.bf16.mxu1 %v1353_v52 }
 0x350   : > { %v1322_v59 = vadd.bf16 %v4633_v37, %v1286_v53  ;;  %1633 = vmatmul.mubr.bf16.gmra.mrb[52].mxu1 %v1352_v56 }
 0x351   : > { %v1323_v60 = vadd.bf16 %v4636_v39, %v1287_v58 }
 0x352   : > { %v1338_v61 = vmul.bf16 1009007652, %v1322_v59 }
 0x353   : > { %v1339_v22 = vmul.bf16 1009007652, %v1323_v60  ;;  %v1265_v24 = vpop.f32.mrb[44].mxu0 }
 0x354   : > { %v1267_v62 = vpop.f32.mrb[45].mxu0  ;;  %v1354_v3 = vmax.bf16 %v1338_v61, %v1322_v59 }
 0x355   : > { %v1269_v63 = vpop.f32.mrb[46].mxu0  ;;  %v1355_v0 = vmax.bf16 %v1339_v22, %v1323_v60 }
 0x356   : > { %v1288_v1 = vpack.c.bf16 %v1269_v63, %v1265_v24  ;;  %v1271_v2 = vpop.f32.mrb[47].mxu0 }
 0x357   : > { %v1289_v4 = vpack.c.bf16 %v1271_v2, %v1267_v62  ;;  %1642 = vmatprep.mubr.bf16.mxu1 %v1355_v0 }
 0x358   : > { %v1324_v5 = vadd.bf16 %v4633_v37, %v1288_v1  ;;  %1643 = vmatmul.mubr.bf16.gmra.mrb[56].mxu1 %v1354_v3  ;;  %v1679_v37 = vshrl.u32 %v4621_v30, 16 }
 0x359   : > { %v1325_v6 = vadd.bf16 %v4636_v39, %v1289_v4  ;;  %v1686_v39 = vshrl.u32 %v4623_v31, 16 }
 0x35a   : > { %v1340_v7 = vmul.bf16 1009007652, %v1324_v5  ;;  %v1680_v17 = vpack.i.b16 %v1679_v37, %v1679_v37 }
 0x35b   : > { %v1341_v8 = vmul.bf16 1009007652, %v1325_v6  ;;  %v1687_v18 = vpack.i.b16 %v1686_v39, %v1686_v39 }
 0x35c   : > { %v1356_v10 = vmax.bf16 %v1340_v7, %v1324_v5  ;;  %v4657_v21 = vrot.slane %v1680_v17, %v4628_v33 }
 0x35d   : > { %v1357_v9 = vmax.bf16 %v1341_v8, %v1325_v6  ;;  %v4660_v25 = vrot.slane %v1687_v18, %v4628_v33 }
 0x35f   : > { %1652 = vmatprep.mubr.bf16.mxu1 %v1357_v9 }
 0x360   : > { %1653 = vmatmul.mubr.bf16.gmra.mrb[60].mxu1 %v1356_v10 }
 0x3fb   : > { %v1584_v19 = vpop.f32.mrb[32].mxu1 }
 0x3fc   : > { %v1586_v20 = vpop.f32.mrb[33].mxu1 }
 0x3fd   : > { %v1588_v23 = vpop.f32.mrb[34].mxu1 }
 0x3fe   : > { %v1663_v27 = vpack.c.bf16 %v1588_v23, %v1584_v19  ;;  %v1590_v28 = vpop.f32.mrb[35].mxu1 }
 0x3ff   : > { %v1664_v29 = vpack.c.bf16 %v1590_v28, %v1586_v20 }
 0x400   : > { %v1693_v32 = vadd.bf16 %v4657_v21, %v1663_v27 }
 0x401   : > { %v1694_v30 = vadd.bf16 %v4660_v25, %v1664_v29 }
 0x402   : > { %v1709_v34 = vmul.bf16 1009007652, %v1693_v32 }
 0x403   : > { %v1710_v31 = vmul.bf16 1009007652, %v1694_v30  ;;  %v1594_v35 = vpop.f32.mrb[36].mxu1 }
 0x404   : > { %v1596_v36 = vpop.f32.mrb[37].mxu1  ;;  %v1725_v41 = vmax.bf16 %v1709_v34, %v1693_v32 }
 0x405   : > { %v1598_v38 = vpop.f32.mrb[38].mxu1  ;;  %v1726_v40 = vmax.bf16 %v1710_v31, %v1694_v30 }
 0x406   : > { %v1665_v42 = vpack.c.bf16 %v1598_v38, %v1594_v35  ;;  %v1600_v43 = vpop.f32.mrb[39].mxu1 }
 0x407   : > { %v1666_v44 = vpack.c.bf16 %v1600_v43, %v1596_v36  ;;  %1965 = vmatprep.mubr.bf16.mxu0 %v1726_v40 }
 0x408   : > { %v1695_v45 = vadd.bf16 %v4657_v21, %v1665_v42  ;;  %1966 = vmatmul.mubr.bf16.vlgmr.msra.gmra.mrb[48].mxu0 %v1725_v41 }
 0x409   : > { %v1696_v46 = vadd.bf16 %v4660_v25, %v1666_v44 }
 0x40a   : > { %v1711_v26 = vmul.bf16 1009007652, %v1695_v45 }
 0x40b   : > { %v1712_v47 = vmul.bf16 1009007652, %v1696_v46  ;;  %v1604_v48 = vpop.f32.mrb[40].mxu1 }
 0x40c   : > { %v1606_v49 = vpop.f32.mrb[41].mxu1  ;;  %v1727_v55 = vmax.bf16 %v1711_v26, %v1695_v45 }
 0x40d   : > { %v1608_v50 = vpop.f32.mrb[42].mxu1  ;;  %v1728_v51 = vmax.bf16 %v1712_v47, %v1696_v46 }
 0x40e   : > { %v1667_v52 = vpack.c.bf16 %v1608_v50, %v1604_v48  ;;  %v1610_v53 = vpop.f32.mrb[43].mxu1 }
 0x40f   : > { %v1668_v56 = vpack.c.bf16 %v1610_v53, %v1606_v49  ;;  %1975 = vmatprep.mubr.bf16.mxu0 %v1728_v51 }
 0x410   : > { %v1697_v58 = vadd.bf16 %v4657_v21, %v1667_v52  ;;  %1976 = vmatmul.mubr.bf16.gmra.mrb[52].mxu0 %v1727_v55 }
 0x411   : > { %v1698_v59 = vadd.bf16 %v4660_v25, %v1668_v56 }
 0x412   : > { %v1713_v60 = vmul.bf16 1009007652, %v1697_v58 }
 0x413   : > { %v1714_v61 = vmul.bf16 1009007652, %v1698_v59  ;;  %v1614_v22 = vpop.f32.mrb[44].mxu1 }
 0x414   : > { %v1616_v24 = vpop.f32.mrb[45].mxu1  ;;  %v1729_v2 = vmax.bf16 %v1713_v60, %v1697_v58 }
 0x415   : > { %v1618_v62 = vpop.f32.mrb[46].mxu1  ;;  %v1730_v63 = vmax.bf16 %v1714_v61, %v1698_v59 }
 0x416   : > { %v1669_v0 = vpack.c.bf16 %v1618_v62, %v1614_v22  ;;  %v1620_v1 = vpop.f32.mrb[47].mxu1 }
 0x417   : > { %v1670_v3 = vpack.c.bf16 %v1620_v1, %v1616_v24  ;;  %1985 = vmatprep.mubr.bf16.mxu0 %v1730_v63  ;;  %v3731_v63 = vld [vmem:[#allocation5 + $0x4] ss:$8 sps:$4 sm:$0xff]   ;;  %v3734_v1 = vld [vmem:[#allocation5 + $0x14] ss:$8 sps:$4 sm:$0xff]  }
 0x418   : > { %v1699_v4 = vadd.bf16 %v4657_v21, %v1669_v0  ;;  %1986 = vmatmul.mubr.bf16.gmra.mrb[56].mxu0 %v1729_v2  ;;  %v3729_v0 = vld [vmem:[#allocation5] ss:$8 sps:$4 sm:$0xff]   ;;  %2519 = vmatprep.subr.bf16.mxu1 %v3731_v63  ;;  %v3732_v2 = vld [vmem:[#allocation5 + $0x10] ss:$8 sps:$4 sm:$0xff]   ;;  %v3812_v63 = vld [vmem:[#allocation7 + $0xb4] ss:$8 sps:$4 sm:$0xff]  }
 0x419   : > { %v1700_v5 = vadd.bf16 %v4660_v25, %v1670_v3  ;;  %2520 = vmatpush1.bf16.msra.mxu1 %v3729_v0  ;;  %v3737_v3 = vld [vmem:[#allocation5 + $0x24] ss:$8 sps:$4 sm:$0xff]  }
 0x41a   : > { %v1715_v6 = vmul.bf16 1009007652, %v1699_v4  ;;  %2521 = vmatprep.subr.bf16.mxu1 %v3734_v1 }
 0x41b   : > { %v1716_v7 = vmul.bf16 1009007652, %v1700_v5  ;;  %v1624_v8 = vpop.f32.mrb[48].mxu1 }
 0x41c   : > { %v1626_v9 = vpop.f32.mrb[49].mxu1  ;;  %v1731_v14 = vmax.bf16 %v1715_v6, %v1699_v4  ;;  %v3735_v4 = vld [vmem:[#allocation5 + $0x20] ss:$8 sps:$4 sm:$0xff]  }
 0x41d   : > { %v1628_v10 = vpop.f32.mrb[50].mxu1  ;;  %v1732_v11 = vmax.bf16 %v1716_v7, %v1700_v5  ;;  %2522 = vmatpush1.bf16.msra.mxu1 %v3732_v2  ;;  %v3743_v5 = vld [vmem:[#allocation5 + $0x44] ss:$8 sps:$4 sm:$0xff]   ;;  %v3741_v6 = vld [vmem:[#allocation5 + $0x40] ss:$8 sps:$4 sm:$0xff]  }
 0x41e   : > { %v1671_v12 = vpack.c.bf16 %v1628_v10, %v1624_v8  ;;  %v1630_v13 = vpop.f32.mrb[51].mxu1  ;;  %2523 = vmatprep.subr.bf16.mxu1 %v3737_v3  ;;  %v3746_v7 = vld [vmem:[#allocation5 + $0x54] ss:$8 sps:$4 sm:$0xff]   ;;  %v3744_v8 = vld [vmem:[#allocation5 + $0x50] ss:$8 sps:$4 sm:$0xff]  }
 0x41f   : > { %v1672_v15 = vpack.c.bf16 %v1630_v13, %v1626_v9  ;;  %1995 = vmatprep.mubr.bf16.mxu0 %v1732_v11  ;;  %v3749_v9 = vld [vmem:[#allocation5 + $0x64] ss:$8 sps:$4 sm:$0xff]   ;;  %v3747_v10 = vld [vmem:[#allocation5 + $0x60] ss:$8 sps:$4 sm:$0xff]   ;;  %v3752_v11 = vld [vmem:[#allocation5 + $0x74] ss:$8 sps:$4 sm:$0xff]  }
 0x420   : > { %v1701_v16 = vadd.bf16 %v4657_v21, %v1671_v12  ;;  %1996 = vmatmul.mubr.bf16.gmra.mrb[60].mxu0 %v1731_v14  ;;  %v3750_v12 = vld [vmem:[#allocation5 + $0x70] ss:$8 sps:$4 sm:$0xff]   ;;  %v3755_v13 = vld [vmem:[#allocation5 + $0x84] ss:$8 sps:$4 sm:$0xff]   ;;  %v3753_v14 = vld [vmem:[#allocation5 + $0x80] ss:$8 sps:$4 sm:$0xff]  }
 0x421   : > { %v1702_v37 = vadd.bf16 %v4660_v25, %v1672_v15  ;;  %2524 = vmatpush1.bf16.msra.mxu1 %v3735_v4  ;;  %v3758_v15 = vld [vmem:[#allocation5 + $0x94] ss:$8 sps:$4 sm:$0xff]  }
 0x422   : > { %v1717_v39 = vmul.bf16 1009007652, %v1701_v16 }
 0x423   : > { %v1718_v17 = vmul.bf16 1009007652, %v1702_v37  ;;  %v1634_v18 = vpop.f32.mrb[52].mxu1 }
 0x424   : > { %v1636_v19 = vpop.f32.mrb[53].mxu1  ;;  %v1733_v29 = vmax.bf16 %v1717_v39, %v1701_v16  ;;  %v3756_v16 = vld [vmem:[#allocation5 + $0x90] ss:$8 sps:$4 sm:$0xff]   ;;  %v3759_v39 = vld [vmem:[#allocation5 + $0xa0] ss:$8 sps:$4 sm:$0xff]  }
 0x425   : > { %v1638_v20 = vpop.f32.mrb[54].mxu1  ;;  %v1734_v23 = vmax.bf16 %v1718_v17, %v1702_v37  ;;  %v3761_v37 = vld [vmem:[#allocation5 + $0xa4] ss:$8 sps:$4 sm:$0xff]   ;;  %v3764_v17 = vld [vmem:[#allocation5 + $0xb4] ss:$8 sps:$4 sm:$0xff]  }
 0x426   : > { %v1673_v27 = vpack.c.bf16 %v1638_v20, %v1634_v18  ;;  %v1640_v28 = vpop.f32.mrb[55].mxu1  ;;  %v3762_v18 = vld [vmem:[#allocation5 + $0xb0] ss:$8 sps:$4 sm:$0xff]   ;;  %v3765_v20 = vld [vmem:[#allocation5 + $0xc0] ss:$8 sps:$4 sm:$0xff]  }
 0x427   : > { %v1674_v32 = vpack.c.bf16 %v1640_v28, %v1636_v19  ;;  %2005 = vmatprep.mubr.bf16.mxu0 %v1734_v23  ;;  %v3767_v19 = vld [vmem:[#allocation5 + $0xc4] ss:$8 sps:$4 sm:$0xff]   ;;  %v3770_v23 = vld [vmem:[#allocation5 + $0xd4] ss:$8 sps:$4 sm:$0xff]  }
 0x428   : > { %v1703_v30 = vadd.bf16 %v4657_v21, %v1673_v27  ;;  %2006 = vmatmul.mubr.bf16.gmra.mrb[64].mxu0 %v1733_v29  ;;  %v3768_v27 = vld [vmem:[#allocation5 + $0xd0] ss:$8 sps:$4 sm:$0xff]   ;;  %v3773_v28 = vld [vmem:[#allocation5 + $0xe4] ss:$8 sps:$4 sm:$0xff]   ;;  %v3771_v29 = vld [vmem:[#allocation5 + $0xe0] ss:$8 sps:$4 sm:$0xff]  }
 0x429   : > { %v1704_v34 = vadd.bf16 %v4660_v25, %v1674_v32  ;;  %v3776_v32 = vld [vmem:[#allocation5 + $0xf4] ss:$8 sps:$4 sm:$0xff]  }
 0x42a   : > { %v1719_v31 = vmul.bf16 1009007652, %v1703_v30 }
 0x42b   : > { %v1720_v35 = vmul.bf16 1009007652, %v1704_v34  ;;  %v1644_v36 = vpop.f32.mrb[56].mxu1 }
 0x42c   : > { %v1646_v38 = vpop.f32.mrb[57].mxu1  ;;  %v1735_v44 = vmax.bf16 %v1719_v31, %v1703_v30  ;;  %v3774_v30 = vld [vmem:[#allocation5 + $0xf0] ss:$8 sps:$4 sm:$0xff]   ;;  %v3779_v31 = vld [vmem:[#allocation7 + $0x4] ss:$8 sps:$4 sm:$0xff]  }
 0x42d   : > { %v1648_v40 = vpop.f32.mrb[58].mxu1  ;;  %v1736_v41 = vmax.bf16 %v1720_v35, %v1704_v34  ;;  %v3777_v34 = vld [vmem:[#allocation7] ss:$8 sps:$4 sm:$0xff]   ;;  %v3782_v35 = vld [vmem:[#allocation7 + $0x14] ss:$8 sps:$4 sm:$0xff]   ;;  %2771 = vmatprep.subr.bf16.mxu0 %v3779_v31 }
 0x42e   : > { %v1675_v42 = vpack.c.bf16 %v1648_v40, %v1644_v36  ;;  %v1650_v43 = vpop.f32.mrb[59].mxu1  ;;  %2772 = vmatpush1.bf16.msra.mxu0 %v3777_v34  ;;  %v3780_v36 = vld [vmem:[#allocation7 + $0x10] ss:$8 sps:$4 sm:$0xff]   ;;  %v3783_v40 = vld [vmem:[#allocation7 + $0x20] ss:$8 sps:$4 sm:$0xff]  }
 0x42f   : > { %v1676_v45 = vpack.c.bf16 %v1650_v43, %v1646_v38  ;;  %2015 = vmatprep.mubr.bf16.mxu0 %v1736_v41  ;;  %2773 = vmatprep.subr.bf16.mxu0 %v3782_v35  ;;  %v3785_v38 = vld [vmem:[#allocation7 + $0x24] ss:$8 sps:$4 sm:$0xff]   ;;  %v3788_v41 = vld [vmem:[#allocation7 + $0x34] ss:$8 sps:$4 sm:$0xff]  }
 0x430   : > { %v1705_v46 = vadd.bf16 %v4657_v21, %v1675_v42  ;;  %2016 = vmatmul.mubr.bf16.gmra.mrb[68].mxu0 %v1735_v44  ;;  %v3786_v42 = vld [vmem:[#allocation7 + $0x30] ss:$8 sps:$4 sm:$0xff]   ;;  %v3791_v43 = vld [vmem:[#allocation7 + $0x44] ss:$8 sps:$4 sm:$0xff]   ;;  %v3789_v44 = vld [vmem:[#allocation7 + $0x40] ss:$8 sps:$4 sm:$0xff]  }
 0x431   : > { %v1706_v26 = vadd.bf16 %v4660_v25, %v1676_v45  ;;  %v3794_v45 = vld [vmem:[#allocation7 + $0x54] ss:$8 sps:$4 sm:$0xff]  }
 0x432   : > { %v1721_v47 = vmul.bf16 1009007652, %v1705_v46  ;;  %2774 = vmatpush1.bf16.msra.mxu0 %v3780_v36 }
 0x433   : > { %v1722_v48 = vmul.bf16 1009007652, %v1706_v26  ;;  %v1654_v49 = vpop.f32.mrb[60].mxu1  ;;  %2775 = vmatprep.subr.bf16.mxu0 %v3785_v38 }
 0x434   : > { %v1656_v50 = vpop.f32.mrb[61].mxu1  ;;  %v1737_v56 = vmax.bf16 %v1721_v47, %v1705_v46  ;;  %v3792_v46 = vld [vmem:[#allocation7 + $0x50] ss:$8 sps:$4 sm:$0xff]   ;;  %v3795_v47 = vld [vmem:[#allocation7 + $0x60] ss:$8 sps:$4 sm:$0xff]  }
 0x435   : > { %v1658_v51 = vpop.f32.mrb[62].mxu1  ;;  %v1738_v52 = vmax.bf16 %v1722_v48, %v1706_v26  ;;  %v3797_v26 = vld [vmem:[#allocation7 + $0x64] ss:$8 sps:$4 sm:$0xff]   ;;  %v3800_v48 = vld [vmem:[#allocation7 + $0x74] ss:$8 sps:$4 sm:$0xff]  }
 0x436   : > { %v1677_v53 = vpack.c.bf16 %v1658_v51, %v1654_v49  ;;  %v1660_v55 = vpop.f32.mrb[63].mxu1  ;;  %2776 = vmatpush1.bf16.msra.mxu0 %v3783_v40  ;;  %v3798_v49 = vld [vmem:[#allocation7 + $0x70] ss:$8 sps:$4 sm:$0xff]   ;;  %v2062_v51 = vld [vmem:[%s4783_s9] sm:$0x44] }
 0x437   : > { %v1678_v58 = vpack.c.bf16 %v1660_v55, %v1656_v50  ;;  %2025 = vmatprep.mubr.bf16.mxu0 %v1738_v52  ;;  %2777 = vmatprep.subr.bf16.mxu0 %v3788_v41  ;;  %v3803_v50 = vld [vmem:[#allocation7 + $0x84] ss:$8 sps:$4 sm:$0xff]   ;;  %v3801_v52 = vld [vmem:[#allocation7 + $0x80] ss:$8 sps:$4 sm:$0xff]   ;;  %v3329_v55 = vcombine.low %v2062_v51, %v2062_v51 }
 0x438   : > { %v1707_v59 = vadd.bf16 %v4657_v21, %v1677_v53  ;;  %2026 = vmatmul.mubr.bf16.gmra.mrb[72].mxu0 %v1737_v56  ;;  %v3740_v21 = vld [vmem:[#allocation5 + $0x34] ss:$8 sps:$4 sm:$0xff]   ;;  %v3330_v56 = vcombine.high %v2062_v51, %v2062_v51 }
 0x439   : > { %v1708_v60 = vadd.bf16 %v4660_v25, %v1678_v58  ;;  %v3738_v25 = vld [vmem:[#allocation5 + $0x30] ss:$8 sps:$4 sm:$0xff]   ;;  %2525 = vmatprep.subr.bf16.mxu1 %v3740_v21  ;;  %v3806_v53 = vld [vmem:[#allocation7 + $0x94] ss:$8 sps:$4 sm:$0xff]  }
 0x43a   : > { %v1723_v61 = vmul.bf16 1009007652, %v1707_v59  ;;  %2526 = vmatpush1.bf16.msra.mxu1 %v3738_v25  ;;  %2778 = vmatpush1.bf16.msra.mxu0 %v3786_v42  ;;  %v3804_v58 = vld [vmem:[#allocation7 + $0x90] ss:$8 sps:$4 sm:$0xff]  }
 0x43b   : > { %v1724_v22 = vmul.bf16 1009007652, %v1708_v60  ;;  %2527 = vmatprep.subr.bf16.mxu1 %v3743_v5  ;;  %2779 = vmatprep.subr.bf16.mxu0 %v3791_v43  ;;  %v3810_v25 = vld [vmem:[#allocation7 + $0xb0] ss:$8 sps:$4 sm:$0xff]  }
 0x43c   : > { %v1739_v62 = vmax.bf16 %v1723_v61, %v1707_v59  ;;  %v3809_v59 = vld [vmem:[#allocation7 + $0xa4] ss:$8 sps:$4 sm:$0xff]   ;;  %v2073_v61 = vsub.s32 2, %v4463_v54 }
 0x43d   : > { %v1740_v24 = vmax.bf16 %v1724_v22, %v1708_v60  ;;  %v2069_v60 = vpack.i.b16 %v3329_v55, %v3329_v55  ;;  %v2076_v22 = vpack.i.b16 %v3330_v56, %v3330_v56 }
 0x43e   : > { %2528 = vmatpush1.bf16.msra.mxu1 %v3741_v6  ;;  %2780 = vmatpush1.bf16.msra.mxu0 %v3789_v44  ;;  %v3815_v6 = vld [vmem:[#allocation7 + $0xc4] ss:$8 sps:$4 sm:$0xff]  }
 0x43f   : > { %2035 = vmatprep.mubr.bf16.mxu0 %v1740_v24  ;;  %2529 = vmatprep.subr.bf16.mxu1 %v3746_v7  ;;  %v3807_v24 = vld [vmem:[#allocation7 + $0xa0] ss:$8 sps:$4 sm:$0xff]   ;;  %v4682_v1 = vrot.slane %v2069_v60, %v2073_v61  ;;  %v4684_v3 = vrot.slane %v2076_v22, %v2073_v61 }
 0x440   : > { %2036 = vmatmul.mubr.bf16.gmra.mrb[76].mxu0 %v1739_v62  ;;  %2781 = vmatprep.subr.bf16.mxu0 %v3794_v45 }
 0x442   : > { %2530 = vmatpush1.bf16.msra.mxu1 %v3744_v8  ;;  %2782 = vmatpush1.bf16.msra.mxu0 %v3792_v46 }
 0x443   : > { %2531 = vmatprep.subr.bf16.mxu1 %v3749_v9  ;;  %2783 = vmatprep.subr.bf16.mxu0 %v3797_v26 }
 0x446   : > { %2532 = vmatpush1.bf16.msra.mxu1 %v3747_v10  ;;  %2784 = vmatpush1.bf16.msra.mxu0 %v3795_v47  ;;  %v3813_v10 = vld [vmem:[#allocation7 + $0xc0] ss:$8 sps:$4 sm:$0xff]  }
 0x447   : > { %2533 = vmatprep.subr.bf16.mxu1 %v3752_v11  ;;  %2785 = vmatprep.subr.bf16.mxu0 %v3800_v48 }
 0x44a   : > { %2534 = vmatpush1.bf16.msra.mxu1 %v3750_v12  ;;  %2786 = vmatpush1.bf16.msra.mxu0 %v3798_v49 }
 0x44b   : > { %2535 = vmatprep.subr.bf16.mxu1 %v3755_v13  ;;  %2787 = vmatprep.subr.bf16.mxu0 %v3803_v50 }
 0x44e   : > { %2536 = vmatpush1.bf16.msra.mxu1 %v3753_v14  ;;  %2788 = vmatpush1.bf16.msra.mxu0 %v3801_v52  ;;  %v3818_v14 = vld [vmem:[#allocation7 + $0xd4] ss:$8 sps:$4 sm:$0xff]  }
 0x44f   : > { %2537 = vmatprep.subr.bf16.mxu1 %v3758_v15  ;;  %2789 = vmatprep.subr.bf16.mxu0 %v3806_v53 }
 0x452   : > { %2538 = vmatpush1.bf16.msra.mxu1 %v3756_v16  ;;  %2790 = vmatpush1.bf16.msra.mxu0 %v3804_v58 }
 0x453   : > { %2539 = vmatprep.subr.bf16.mxu1 %v3761_v37  ;;  %2791 = vmatprep.subr.bf16.mxu0 %v3809_v59 }
 0x456   : > { %2540 = vmatpush1.bf16.msra.mxu1 %v3759_v39  ;;  %2792 = vmatpush1.bf16.msra.mxu0 %v3807_v24 }
 0x457   : > { %2541 = vmatprep.subr.bf16.mxu1 %v3764_v17  ;;  %2793 = vmatprep.subr.bf16.mxu0 %v3812_v63 }
 0x45a   : > { %2542 = vmatpush1.bf16.msra.mxu1 %v3762_v18  ;;  %2794 = vmatpush1.bf16.msra.mxu0 %v3810_v25 }
 0x45b   : > { %2543 = vmatprep.subr.bf16.mxu1 %v3767_v19  ;;  %2795 = vmatprep.subr.bf16.mxu0 %v3815_v6 }
 0x45e   : > { %2544 = vmatpush1.bf16.msra.mxu1 %v3765_v20  ;;  %2796 = vmatpush1.bf16.msra.mxu0 %v3813_v10  ;;  %v3816_v20 = vld [vmem:[#allocation7 + $0xd0] ss:$8 sps:$4 sm:$0xff]  }
 0x45f   : > { %2545 = vmatprep.subr.bf16.mxu1 %v3770_v23  ;;  %2797 = vmatprep.subr.bf16.mxu0 %v3818_v14 }
 0x462   : > { %2546 = vmatpush1.bf16.msra.mxu1 %v3768_v27  ;;  %2798 = vmatpush1.bf16.msra.mxu0 %v3816_v20 }
 0x463   : > { %2547 = vmatprep.subr.bf16.mxu1 %v3773_v28 }
 0x466   : > { %2548 = vmatpush1.bf16.msra.mxu1 %v3771_v29 }
 0x467   : > { %2549 = vmatprep.subr.bf16.mxu1 %v3776_v32 }
 0x46a   : > { %2550 = vmatpush1.bf16.msra.mxu1 %v3774_v30 }
 0x4db   : > { %v1967_v62 = vpop.f32.mrb[48].mxu0 }
 0x4dc   : > { %v1969_v0 = vpop.f32.mrb[49].mxu0 }
 0x4dd   : > { %v1971_v2 = vpop.f32.mrb[50].mxu0 }
 0x4de   : > { %v2046_v4 = vpack.c.bf16 %v1971_v2, %v1967_v62  ;;  %v1973_v21 = vpop.f32.mrb[51].mxu0 }
 0x4df   : > { %v2047_v5 = vpack.c.bf16 %v1973_v21, %v1969_v0 }
 0x4e0   : > { %v2082_v54 = vadd.bf16 %v4682_v1, %v2046_v4 }
 0x4e1   : > { %v2083_v7 = vadd.bf16 %v4684_v3, %v2047_v5 }
 0x4e2   : > { %v2098_v8 = vunpack.i.l.bf16 %v2082_v54  ;;  %v2099_v9 = vunpack.i.h.bf16 %v2082_v54 }
 0x4e3   : > { %v2108_v11 = vunpack.i.l.bf16 %v2083_v7  ;;  %v2109_v12 = vunpack.i.h.bf16 %v2083_v7  ;;  %v1977_v13 = vpop.f32.mrb[52].mxu0 }
 0x4e4   : > { %v2100_v15 = vmax.f32 %v2098_v8, %v2099_v9  ;;  %v1979_v16 = vpop.f32.mrb[53].mxu0 }
 0x4e5   : > { %v2110_v37 = vmax.f32 %v2108_v11, %v2109_v12  ;;  %v1981_v39 = vpop.f32.mrb[54].mxu0 }
 0x4e6   : > { %v2101_v17 = vrot.slane %v2100_v15, 4  ;;  %v2048_v18 = vpack.c.bf16 %v1981_v39, %v1977_v13  ;;  %v1983_v19 = vpop.f32.mrb[55].mxu0 }
 0x4e7   : > { %v2111_v23 = vrot.slane %v2110_v37, 4  ;;  %v2049_v27 = vpack.c.bf16 %v1983_v19, %v1979_v16 }
 0x4e8   : > { %v2102_v28 = vmax.f32 %v2100_v15, %v2101_v17  ;;  %v2084_v29 = vadd.bf16 %v4682_v1, %v2048_v18 }
 0x4e9   : > { %v2112_v32 = vmax.f32 %v2110_v37, %v2111_v23  ;;  %v2085_v30 = vadd.bf16 %v4684_v3, %v2049_v27 }
 0x4ea   : > { %v2103_v34 = vrot.slane %v2102_v28, 2  ;;  %v2118_v31 = vunpack.i.l.bf16 %v2084_v29  ;;  %v2119_v35 = vunpack.i.h.bf16 %v2084_v29 }
 0x4eb   : > { %v2113_v36 = vrot.slane %v2112_v32, 2  ;;  %v2128_v38 = vunpack.i.l.bf16 %v2085_v30  ;;  %v2129_v40 = vunpack.i.h.bf16 %v2085_v30  ;;  %v1987_v41 = vpop.f32.mrb[56].mxu0 }
 0x4ec   : > { %v2104_v42 = vmax.f32 %v2102_v28, %v2103_v34  ;;  %v2120_v43 = vmax.f32 %v2118_v31, %v2119_v35  ;;  %v1989_v44 = vpop.f32.mrb[57].mxu0 }
 0x4ed   : > { %v2114_v45 = vmax.f32 %v2112_v32, %v2113_v36  ;;  %v2130_v46 = vmax.f32 %v2128_v38, %v2129_v40  ;;  %v1991_v26 = vpop.f32.mrb[58].mxu0 }
 0x4ee   : > { %v2121_v47 = vrot.slane %v2120_v43, 4  ;;  %v2050_v48 = vpack.c.bf16 %v1991_v26, %v1987_v41  ;;  %v1993_v49 = vpop.f32.mrb[59].mxu0  ;;  %v2105_v52 = vrot.slane %v2104_v42, 1 }
 0x4ef   : > { %v2131_v50 = vrot.slane %v2130_v46, 4  ;;  %v2051_v51 = vpack.c.bf16 %v1993_v49, %v1989_v44  ;;  %v2115_v56 = vrot.slane %v2114_v45, 1 }
 0x4f0   : > { %v2122_v53 = vmax.f32 %v2120_v43, %v2121_v47  ;;  %v2086_v55 = vadd.bf16 %v4682_v1, %v2050_v48  ;;  %v2106_v2 = vmax.f32 %v2104_v42, %v2105_v52 }
 0x4f1   : > { %v2132_v58 = vmax.f32 %v2130_v46, %v2131_v50  ;;  %v2087_v59 = vadd.bf16 %v4684_v3, %v2051_v51  ;;  %v2116_v5 = vmax.f32 %v2114_v45, %v2115_v56 }
 0x4f2   : > { %v2123_v60 = vrot.slane %v2122_v53, 2  ;;  %v2138_v61 = vunpack.i.l.bf16 %v2086_v55  ;;  %v2139_v22 = vunpack.i.h.bf16 %v2086_v55  ;;  %v2107_v15 = vpack.i.bf16 %v2106_v2, %v2106_v2 }
 0x4f3   : > { %v2133_v24 = vrot.slane %v2132_v58, 2  ;;  %v2148_v62 = vunpack.i.l.bf16 %v2087_v59  ;;  %v2149_v63 = vunpack.i.h.bf16 %v2087_v59  ;;  %v1997_v0 = vpop.f32.mrb[60].mxu0  ;;  %v2117_v17 = vpack.i.bf16 %v2116_v5, %v2116_v5 }
 0x4f4   : > { %v2124_v4 = vmax.f32 %v2122_v53, %v2123_v60  ;;  %v2140_v21 = vmax.f32 %v2138_v61, %v2139_v22  ;;  %v1999_v25 = vpop.f32.mrb[61].mxu0  ;;  %v2318_v36 = vunpack.c.l.b16 %v2107_v15 }
 0x4f5   : > { %v2134_v6 = vmax.f32 %v2132_v58, %v2133_v24  ;;  %v2150_v54 = vmax.f32 %v2148_v62, %v2149_v63  ;;  %v2001_v7 = vpop.f32.mrb[62].mxu0  ;;  %v2319_v43 = vunpack.c.l.b16 %v2117_v17 }
 0x4f6   : > { %v2125_v8 = vrot.slane %v2124_v4, 1  ;;  %v2141_v9 = vrot.slane %v2140_v21, 4  ;;  %v2052_v10 = vpack.c.bf16 %v2001_v7, %v1997_v0  ;;  %v2003_v11 = vpop.f32.mrb[63].mxu0 }
 0x4f7   : > { %v2135_v12 = vrot.slane %v2134_v6, 1  ;;  %v2151_v13 = vrot.slane %v2150_v54, 4  ;;  %v2053_v14 = vpack.c.bf16 %v2003_v11, %v1999_v25 }
 0x4f8   : > { %v2126_v16 = vmax.f32 %v2124_v4, %v2125_v8  ;;  %v2142_v37 = vmax.f32 %v2140_v21, %v2141_v9  ;;  %v2088_v39 = vadd.bf16 %v4682_v1, %v2052_v10 }
 0x4f9   : > { %v2136_v18 = vmax.f32 %v2134_v6, %v2135_v12  ;;  %v2152_v19 = vmax.f32 %v2150_v54, %v2151_v13  ;;  %v2089_v20 = vadd.bf16 %v4684_v3, %v2053_v14 }
 0x4fa   : > { %v2127_v23 = vpack.i.bf16 %v2126_v16, %v2126_v16  ;;  %v2143_v27 = vrot.slane %v2142_v37, 2  ;;  %v2158_v28 = vunpack.i.l.bf16 %v2088_v39  ;;  %v2159_v29 = vunpack.i.h.bf16 %v2088_v39 }
 0x4fb   : > { %v2137_v32 = vpack.i.bf16 %v2136_v18, %v2136_v18  ;;  %v2153_v30 = vrot.slane %v2152_v19, 2  ;;  %v2168_v34 = vunpack.i.l.bf16 %v2089_v20  ;;  %v2169_v31 = vunpack.i.h.bf16 %v2089_v20  ;;  %v2007_v35 = vpop.f32.mrb[64].mxu0 }
 0x4fc   : > { %v2320_v38 = vunpack.c.l.b16 %v2127_v23  ;;  %v2144_v40 = vmax.f32 %v2142_v37, %v2143_v27  ;;  %v2160_v41 = vmax.f32 %v2158_v28, %v2159_v29  ;;  %v2009_v42 = vpop.f32.mrb[65].mxu0 }
 0x4fd   : > { %v2321_v44 = vunpack.c.l.b16 %v2137_v32  ;;  %v2154_v45 = vmax.f32 %v2152_v19, %v2153_v30  ;;  %v2170_v46 = vmax.f32 %v2168_v34, %v2169_v31  ;;  %v2011_v26 = vpop.f32.mrb[66].mxu0 }
 0x4fe   : > { %v2335_v47 = vsel %vm2334_vm2, %v2320_v38, %v2318_v36  ;;  %v2145_v48 = vrot.slane %v2144_v40, 1  ;;  %v2161_v49 = vrot.slane %v2160_v41, 4  ;;  %v2054_v50 = vpack.c.bf16 %v2011_v26, %v2007_v35  ;;  %v2013_v51 = vpop.f32.mrb[67].mxu0 }
 0x4ff   : > { %v2155_v52 = vrot.slane %v2154_v45, 1  ;;  %v2171_v53 = vrot.slane %v2170_v46, 4  ;;  %v2055_v55 = vpack.c.bf16 %v2013_v51, %v2009_v42  ;;  %v2348_v56 = vsel %vm2334_vm2, %v2321_v44, %v2319_v43 }
 0x500   : > { %v2146_v58 = vmax.f32 %v2144_v40, %v2145_v48  ;;  %v2162_v59 = vmax.f32 %v2160_v41, %v2161_v49  ;;  %v2090_v60 = vadd.bf16 %v4682_v1, %v2054_v50 }
 0x501   : > { %v2156_v61 = vmax.f32 %v2154_v45, %v2155_v52  ;;  %v2172_v22 = vmax.f32 %v2170_v46, %v2171_v53  ;;  %v2091_v24 = vadd.bf16 %v4684_v3, %v2055_v55 }
 0x502   : > { %v2147_v62 = vpack.i.bf16 %v2146_v58, %v2146_v58  ;;  %v2163_v63 = vrot.slane %v2162_v59, 2  ;;  %v2178_v0 = vunpack.i.l.bf16 %v2090_v60  ;;  %v2179_v2 = vunpack.i.h.bf16 %v2090_v60 }
 0x503   : > { %v2157_v4 = vpack.i.bf16 %v2156_v61, %v2156_v61  ;;  %v2173_v21 = vrot.slane %v2172_v22, 2  ;;  %v2188_v25 = vunpack.i.l.bf16 %v2091_v24  ;;  %v2189_v5 = vunpack.i.h.bf16 %v2091_v24  ;;  %v2017_v6 = vpop.f32.mrb[68].mxu0 }
 0x504   : > { %v2322_v54 = vunpack.c.l.b16 %v2147_v62  ;;  %v2164_v7 = vmax.f32 %v2162_v59, %v2163_v63  ;;  %v2180_v8 = vmax.f32 %v2178_v0, %v2179_v2  ;;  %v2019_v9 = vpop.f32.mrb[69].mxu0 }
 0x505   : > { %v2323_v10 = vunpack.c.l.b16 %v2157_v4  ;;  %v2174_v11 = vmax.f32 %v2172_v22, %v2173_v21  ;;  %v2190_v12 = vmax.f32 %v2188_v25, %v2189_v5  ;;  %v2021_v13 = vpop.f32.mrb[70].mxu0 }
 0x506   : > { %v2165_v14 = vrot.slane %v2164_v7, 1  ;;  %v2181_v15 = vrot.slane %v2180_v8, 4  ;;  %v2056_v16 = vpack.c.bf16 %v2021_v13, %v2017_v6  ;;  %v2023_v37 = vpop.f32.mrb[71].mxu0  ;;  %v2337_v39 = vsel %vm2336_vm3, %v2322_v54, %v2335_v47 }
 0x507   : > { %v2175_v17 = vrot.slane %v2174_v11, 1  ;;  %v2191_v18 = vrot.slane %v2190_v12, 4  ;;  %v2057_v19 = vpack.c.bf16 %v2023_v37, %v2019_v9  ;;  %v2349_v20 = vsel %vm2336_vm3, %v2323_v10, %v2348_v56 }
 0x508   : > { %v2166_v23 = vmax.f32 %v2164_v7, %v2165_v14  ;;  %v2182_v27 = vmax.f32 %v2180_v8, %v2181_v15  ;;  %v2092_v28 = vadd.bf16 %v4682_v1, %v2056_v16 }
 0x509   : > { %v2176_v29 = vmax.f32 %v2174_v11, %v2175_v17  ;;  %v2192_v32 = vmax.f32 %v2190_v12, %v2191_v18  ;;  %v2093_v30 = vadd.bf16 %v4684_v3, %v2057_v19 }
 0x50a   : > { %v2167_v34 = vpack.i.bf16 %v2166_v23, %v2166_v23  ;;  %v2183_v31 = vrot.slane %v2182_v27, 2  ;;  %v2198_v35 = vunpack.i.l.bf16 %v2092_v28  ;;  %v2199_v36 = vunpack.i.h.bf16 %v2092_v28 }
 0x50b   : > { %v2177_v38 = vpack.i.bf16 %v2176_v29, %v2176_v29  ;;  %v2193_v40 = vrot.slane %v2192_v32, 2  ;;  %v2208_v41 = vunpack.i.l.bf16 %v2093_v30  ;;  %v2209_v42 = vunpack.i.h.bf16 %v2093_v30  ;;  %v2027_v43 = vpop.f32.mrb[72].mxu0 }
 0x50c   : > { %v2324_v44 = vunpack.c.l.b16 %v2167_v34  ;;  %v2184_v45 = vmax.f32 %v2182_v27, %v2183_v31  ;;  %v2200_v46 = vmax.f32 %v2198_v35, %v2199_v36  ;;  %v2029_v26 = vpop.f32.mrb[73].mxu0 }
 0x50d   : > { %v2325_v47 = vunpack.c.l.b16 %v2177_v38  ;;  %v2194_v48 = vmax.f32 %v2192_v32, %v2193_v40  ;;  %v2210_v49 = vmax.f32 %v2208_v41, %v2209_v42  ;;  %v2031_v50 = vpop.f32.mrb[74].mxu0 }
 0x50e   : > { %v2185_v51 = vrot.slane %v2184_v45, 1  ;;  %v2201_v52 = vrot.slane %v2200_v46, 4  ;;  %v2058_v53 = vpack.c.bf16 %v2031_v50, %v2027_v43  ;;  %v2033_v55 = vpop.f32.mrb[75].mxu0  ;;  %v2339_v56 = vsel %vm2338_vm4, %v2324_v44, %v2337_v39 }
 0x50f   : > { %v2195_v58 = vrot.slane %v2194_v48, 1  ;;  %v2211_v59 = vrot.slane %v2210_v49, 4  ;;  %v2059_v60 = vpack.c.bf16 %v2033_v55, %v2029_v26  ;;  %v2350_v61 = vsel %vm2338_vm4, %v2325_v47, %v2349_v20 }
 0x510   : > { %v2186_v22 = vmax.f32 %v2184_v45, %v2185_v51  ;;  %v2202_v24 = vmax.f32 %v2200_v46, %v2201_v52  ;;  %v2094_v62 = vadd.bf16 %v4682_v1, %v2058_v53 }
 0x511   : > { %v2196_v63 = vmax.f32 %v2194_v48, %v2195_v58  ;;  %v2212_v0 = vmax.f32 %v2210_v49, %v2211_v59  ;;  %v2095_v2 = vadd.bf16 %v4684_v3, %v2059_v60 }
 0x512   : > { %v2187_v4 = vpack.i.bf16 %v2186_v22, %v2186_v22  ;;  %v2203_v21 = vrot.slane %v2202_v24, 2  ;;  %v2218_v25 = vunpack.i.l.bf16 %v2094_v62  ;;  %v2219_v5 = vunpack.i.h.bf16 %v2094_v62 }
 0x513   : > { %v2197_v6 = vpack.i.bf16 %v2196_v63, %v2196_v63  ;;  %v2213_v54 = vrot.slane %v2212_v0, 2  ;;  %v2228_v7 = vunpack.i.l.bf16 %v2095_v2  ;;  %v2229_v8 = vunpack.i.h.bf16 %v2095_v2  ;;  %v2037_v9 = vpop.f32.mrb[76].mxu0 }
 0x514   : > { %v2326_v10 = vunpack.c.l.b16 %v2187_v4  ;;  %v2204_v11 = vmax.f32 %v2202_v24, %v2203_v21  ;;  %v2220_v12 = vmax.f32 %v2218_v25, %v2219_v5  ;;  %v2039_v13 = vpop.f32.mrb[77].mxu0 }
 0x515   : > { %v2327_v14 = vunpack.c.l.b16 %v2197_v6  ;;  %v2214_v15 = vmax.f32 %v2212_v0, %v2213_v54  ;;  %v2230_v16 = vmax.f32 %v2228_v7, %v2229_v8  ;;  %v2041_v37 = vpop.f32.mrb[78].mxu0 }
 0x516   : > { %v2205_v39 = vrot.slane %v2204_v11, 1  ;;  %v2221_v17 = vrot.slane %v2220_v12, 4  ;;  %v2060_v18 = vpack.c.bf16 %v2041_v37, %v2037_v9  ;;  %v2043_v19 = vpop.f32.mrb[79].mxu0  ;;  %v2341_v20 = vsel %vm2340_vm5, %v2326_v10, %v2339_v56  ;;  %v3821_v37 = vld [vmem:[#allocation7 + $0xe4] ss:$8 sps:$4 sm:$0xff]  }
 0x517   : > { %v2215_v23 = vrot.slane %v2214_v15, 1  ;;  %v2231_v27 = vrot.slane %v2230_v16, 4  ;;  %v2061_v28 = vpack.c.bf16 %v2043_v19, %v2039_v13  ;;  %v2351_v29 = vsel %vm2340_vm5, %v2327_v14, %v2350_v61  ;;  %2799 = vmatprep.subr.bf16.mxu0 %v3821_v37  ;;  %v3825_v19 = vld [vmem:[#allocation8] ss:$8 sps:$4 sm:$0xff]  }
 0x518   : > { %v2206_v32 = vmax.f32 %v2204_v11, %v2205_v39  ;;  %v2222_v30 = vmax.f32 %v2220_v12, %v2221_v17  ;;  %v2096_v34 = vadd.bf16 %v4682_v1, %v2060_v18  ;;  %v3819_v39 = vld [vmem:[#allocation7 + $0xe0] ss:$8 sps:$4 sm:$0xff]   ;;  %v3824_v17 = vld [vmem:[#allocation7 + $0xf4] ss:$8 sps:$4 sm:$0xff]   ;;  %v3822_v18 = vld [vmem:[#allocation7 + $0xf0] ss:$8 sps:$4 sm:$0xff]  }
 0x519   : > { %v2216_v31 = vmax.f32 %v2214_v15, %v2215_v23  ;;  %v2232_v35 = vmax.f32 %v2230_v16, %v2231_v27  ;;  %v2097_v36 = vadd.bf16 %v4684_v3, %v2061_v28  ;;  %2800 = vmatpush1.bf16.msra.mxu0 %v3819_v39  ;;  %v3830_v23 = vld [vmem:[#allocation8 + $0x14] ss:$8 sps:$4 sm:$0xff]   ;;  %v3828_v27 = vld [vmem:[#allocation8 + $0x10] ss:$8 sps:$4 sm:$0xff]   ;;  %v3833_v28 = vld [vmem:[#allocation8 + $0x24] ss:$8 sps:$4 sm:$0xff]  }
 0x51a   : > { %v2207_v38 = vpack.i.bf16 %v2206_v32, %v2206_v32  ;;  %v2223_v40 = vrot.slane %v2222_v30, 2  ;;  %v2238_v41 = vunpack.i.l.bf16 %v2096_v34  ;;  %v2239_v42 = vunpack.i.h.bf16 %v2096_v34  ;;  %2801 = vmatprep.subr.bf16.mxu0 %v3824_v17  ;;  %v3836_v32 = vld [vmem:[#allocation8 + $0x34] ss:$8 sps:$4 sm:$0xff]   ;;  %v3839_v34 = vld [vmem:[#allocation8 + $0x44] ss:$8 sps:$4 sm:$0xff]  }
 0x51b   : > { %v2217_v43 = vpack.i.bf16 %v2216_v31, %v2216_v31  ;;  %v2233_v44 = vrot.slane %v2232_v35, 2  ;;  %v2248_v45 = vunpack.i.l.bf16 %v2097_v36  ;;  %v2249_v46 = vunpack.i.h.bf16 %v2097_v36  ;;  %v3837_v31 = vld [vmem:[#allocation8 + $0x40] ss:$8 sps:$4 sm:$0xff]   ;;  %v3840_v36 = vld [vmem:[#allocation8 + $0x50] ss:$8 sps:$4 sm:$0xff]  }
 0x51c   : > { %v2328_v26 = vunpack.c.l.b16 %v2207_v38  ;;  %v2224_v47 = vmax.f32 %v2222_v30, %v2223_v40  ;;  %v2240_v48 = vmax.f32 %v2238_v41, %v2239_v42  ;;  %v3834_v30 = vld [vmem:[#allocation8 + $0x30] ss:$8 sps:$4 sm:$0xff]   ;;  %v3845_v38 = vld [vmem:[#allocation8 + $0x64] ss:$8 sps:$4 sm:$0xff]   ;;  %v3843_v40 = vld [vmem:[#allocation8 + $0x60] ss:$8 sps:$4 sm:$0xff]  }
 0x51d   : > { %v2234_v49 = vmax.f32 %v2232_v35, %v2233_v44  ;;  %v2250_v50 = vmax.f32 %v2248_v45, %v2249_v46  ;;  %v2329_v51 = vunpack.c.l.b16 %v2217_v43  ;;  %2802 = vmatpush1.bf16.msra.mxu0 %v3822_v18  ;;  %v3842_v35 = vld [vmem:[#allocation8 + $0x54] ss:$8 sps:$4 sm:$0xff]   ;;  %v3846_v42 = vld [vmem:[#allocation8 + $0x70] ss:$8 sps:$4 sm:$0xff]   ;;  %v3851_v43 = vld [vmem:[#allocation8 + $0x84] ss:$8 sps:$4 sm:$0xff]  }
 0x51e   : > { %v2225_v1 = vrot.slane %v2224_v47, 1  ;;  %v2241_v52 = vrot.slane %v2240_v48, 4  ;;  %v2343_v53 = vsel %vm2342_vm6, %v2328_v26, %v2341_v20  ;;  %v3827_v20 = vld [vmem:[#allocation8 + $0x4] ss:$8 sps:$4 sm:$0xff]   ;;  %v3848_v41 = vld [vmem:[#allocation8 + $0x74] ss:$8 sps:$4 sm:$0xff]  }
 0x51f   : > { %v2235_v3 = vrot.slane %v2234_v49, 1  ;;  %v2251_v55 = vrot.slane %v2250_v50, 4  ;;  %v2352_v56 = vsel %vm2342_vm6, %v2329_v51, %v2351_v29  ;;  %3023 = vmatprep.subr.bf16.mxu1 %v3827_v20  ;;  %v3831_v29 = vld [vmem:[#allocation8 + $0x20] ss:$8 sps:$4 sm:$0xff]   ;;  %v3854_v45 = vld [vmem:[#allocation8 + $0x94] ss:$8 sps:$4 sm:$0xff]  }
 0x520   : > { %v2226_v58 = vmax.f32 %v2224_v47, %v2225_v1  ;;  %v2242_v59 = vmax.f32 %v2240_v48, %v2241_v52  ;;  %v3849_v44 = vld [vmem:[#allocation8 + $0x80] ss:$8 sps:$4 sm:$0xff]   ;;  %v3852_v46 = vld [vmem:[#allocation8 + $0x90] ss:$8 sps:$4 sm:$0xff]   ;;  %v3857_v26 = vld [vmem:[#allocation8 + $0xa4] ss:$8 sps:$4 sm:$0xff]  }
 0x521   : > { %v2252_v60 = vmax.f32 %v2250_v50, %v2251_v55  ;;  %v2236_v61 = vmax.f32 %v2234_v49, %v2235_v3  ;;  %v3855_v47 = vld [vmem:[#allocation8 + $0xa0] ss:$8 sps:$4 sm:$0xff]   ;;  %v3860_v48 = vld [vmem:[#allocation8 + $0xb4] ss:$8 sps:$4 sm:$0xff]   ;;  %v3858_v49 = vld [vmem:[#allocation8 + $0xb0] ss:$8 sps:$4 sm:$0xff]  }
 0x522   : > { %v2227_v22 = vpack.i.bf16 %v2226_v58, %v2226_v58  ;;  %v2243_v24 = vrot.slane %v2242_v59, 2  ;;  %v3863_v50 = vld [vmem:[#allocation8 + $0xc4] ss:$8 sps:$4 sm:$0xff]   ;;  %v3861_v51 = vld [vmem:[#allocation8 + $0xc0] ss:$8 sps:$4 sm:$0xff]  }
 0x523   : > { %v2253_v62 = vrot.slane %v2252_v60, 2  ;;  %v2237_v63 = vpack.i.bf16 %v2236_v61, %v2236_v61  ;;  %v3866_v1 = vld [vmem:[#allocation8 + $0xd4] ss:$8 sps:$4 sm:$0xff]   ;;  %v3864_v52 = vld [vmem:[#allocation8 + $0xd0] ss:$8 sps:$4 sm:$0xff]  }
 0x524   : > { %v2330_v0 = vunpack.c.l.b16 %v2227_v22  ;;  %v2244_v2 = vmax.f32 %v2242_v59, %v2243_v24 }
 0x525   : > { %v2254_v4 = vmax.f32 %v2252_v60, %v2253_v62  ;;  %v2331_v21 = vunpack.c.l.b16 %v2237_v63 }
 0x526   : > { %v2245_v25 = vrot.slane %v2244_v2, 1  ;;  %v2345_v5 = vsel %vm2344_vm7, %v2330_v0, %v2343_v53  ;;  %v2290_v53 = vld [vmem:[%s4784_s10] ss:$8 sm:$0x3] }
 0x527   : > { %v2255_v6 = vrot.slane %v2254_v4, 1  ;;  %v2353_v54 = vsel %vm2344_vm7, %v2331_v21, %v2352_v56  ;;  %v2295_v3 = vrot.slane %v2290_v53, %v4469_v57  ;;  %v2299_v55 = vrot.slane %v2290_v53, %v4628_v33  ;;  %v3869_v21 = vld [vmem:[#allocation8 + $0xe4] ss:$8 sps:$4 sm:$0xff]  }
 0x528   : > { %v2246_v7 = vmax.f32 %v2244_v2, %v2245_v25  ;;  %v3867_v25 = vld [vmem:[#allocation8 + $0xe0] ss:$8 sps:$4 sm:$0xff]  }
 0x529   : > { %v2256_v8 = vmax.f32 %v2254_v4, %v2255_v6  ;;  %v3870_v6 = vld [vmem:[#allocation8 + $0xf0] ss:$8 sps:$4 sm:$0xff]  }
 0x52a   : > { %v2247_v9 = vpack.i.bf16 %v2246_v7, %v2246_v7 }
 0x52b   : > { %v2257_v10 = vpack.i.bf16 %v2256_v8, %v2256_v8 }
 0x52c   : > { %v2332_v11 = vunpack.c.l.b16 %v2247_v9 }
 0x52d   : > { %v2333_v12 = vunpack.c.l.b16 %v2257_v10 }
 0x52e   : > { %v2347_v13 = vsel %vm2346_vm8, %v2332_v11, %v2345_v5  ;;  %v3872_v5 = vld [vmem:[#allocation8 + $0xf4] ss:$8 sps:$4 sm:$0xff]  }
 0x52f   : > { %v2354_v14 = vsel %vm2346_vm8, %v2333_v12, %v2353_v54  ;;  %v2355_v16 = vpack.c.b16 %v2347_v13, %v2347_v13  ;;  %v3363_v54 = vld [vmem:[%s4784_s10 + $0x1] ss:$8 sm:$0x3] }
 0x530   : > { %v2356_v15 = vpack.c.b16 %v2354_v14, %v2354_v14  ;;  %v2604_v7 = vrot.slane %v3363_v54, %v4469_v57  ;;  %v2608_v8 = vrot.slane %v3363_v54, %v4628_v33 }
 0x532   : > { %2551 = vmatprep.mubr.bf16.mxu1 %v2356_v15 }
 0x533   : > { %2552 = vmatmul.mubr.bf16.vlgmr.msra.gmra.mrb[64].mxu1 %v2355_v16 }
 0x534   : > { %3024 = vmatpush1.bf16.msra.mxu1 %v3825_v19  ;;  %v3396_v19 = vld [vmem:[%s4784_s10 + $0x2] ss:$8 sm:$0x3] }
 0x535   : > { %3025 = vmatprep.subr.bf16.mxu1 %v3830_v23  ;;  %v2856_v20 = vrot.slane %v3396_v19, %v4469_v57  ;;  %v2860_v23 = vrot.slane %v3396_v19, %v4628_v33 }
 0x538   : > { %3026 = vmatpush1.bf16.msra.mxu1 %v3828_v27 }
 0x539   : > { %3027 = vmatprep.subr.bf16.mxu1 %v3833_v28 }
 0x53c   : > { %3028 = vmatpush1.bf16.msra.mxu1 %v3831_v29 }
 0x53d   : > { %3029 = vmatprep.subr.bf16.mxu1 %v3836_v32 }
 0x540   : > { %3030 = vmatpush1.bf16.msra.mxu1 %v3834_v30 }
 0x541   : > { %3031 = vmatprep.subr.bf16.mxu1 %v3839_v34 }
 0x544   : > { %3032 = vmatpush1.bf16.msra.mxu1 %v3837_v31 }
 0x545   : > { %3033 = vmatprep.subr.bf16.mxu1 %v3842_v35 }
 0x548   : > { %3034 = vmatpush1.bf16.msra.mxu1 %v3840_v36 }
 0x549   : > { %3035 = vmatprep.subr.bf16.mxu1 %v3845_v38 }
 0x54c   : > { %3036 = vmatpush1.bf16.msra.mxu1 %v3843_v40 }
 0x54d   : > { %3037 = vmatprep.subr.bf16.mxu1 %v3848_v41 }
 0x550   : > { %3038 = vmatpush1.bf16.msra.mxu1 %v3846_v42 }
 0x551   : > { %3039 = vmatprep.subr.bf16.mxu1 %v3851_v43 }
 0x554   : > { %3040 = vmatpush1.bf16.msra.mxu1 %v3849_v44 }
 0x555   : > { %3041 = vmatprep.subr.bf16.mxu1 %v3854_v45 }
 0x558   : > { %3042 = vmatpush1.bf16.msra.mxu1 %v3852_v46 }
 0x559   : > { %3043 = vmatprep.subr.bf16.mxu1 %v3857_v26 }
 0x55c   : > { %3044 = vmatpush1.bf16.msra.mxu1 %v3855_v47 }
 0x55d   : > { %3045 = vmatprep.subr.bf16.mxu1 %v3860_v48 }
 0x560   : > { %3046 = vmatpush1.bf16.msra.mxu1 %v3858_v49 }
 0x561   : > { %3047 = vmatprep.subr.bf16.mxu1 %v3863_v50 }
 0x564   : > { %3048 = vmatpush1.bf16.msra.mxu1 %v3861_v51 }
 0x565   : > { %3049 = vmatprep.subr.bf16.mxu1 %v3866_v1 }
 0x568   : > { %3050 = vmatpush1.bf16.msra.mxu1 %v3864_v52 }
 0x569   : > { %3051 = vmatprep.subr.bf16.mxu1 %v3869_v21 }
 0x56c   : > { %3052 = vmatpush1.bf16.msra.mxu1 %v3867_v25 }
 0x56d   : > { %3053 = vmatprep.subr.bf16.mxu1 %v3872_v5 }
 0x570   : > { %3054 = vmatpush1.bf16.msra.mxu1 %v3870_v6 }
 0x606   : > { %v2553_v56 = vpop.f32.mrb[64].mxu1 }
 0x607   : > { %v2554_v58 = vadd.f32 %v2553_v56, %v2295_v3  ;;  %v2555_v59 = vpop.f32.mrb[65].mxu1 }
 0x608   : > { %v2556_v60 = vadd.f32 %v2555_v59, %v2299_v55  ;;  %v2557_v61 = vpop.f32.mrb[66].mxu1 }
 0x609   : > { %v2560_v22 = vmul.f32 0.01, %v2554_v58  ;;  %v2558_v24 = vpop.f32.mrb[67].mxu1 }
 0x60a   : > { %v2561_v62 = vmul.f32 0.01, %v2556_v60 }
 0x60b   : > { %v2562_v63 = vmax.f32 %v2554_v58, %v2560_v22 }
 0x60c   : > { %v2563_v0 = vmax.f32 %v2556_v60, %v2561_v62 }
 0x60d   : > { %v2564_v4 = vpack.c.bf16 %v2562_v63, %v2562_v63 }
 0x60e   : > { %v2565_v2 = vpack.c.bf16 %v2563_v0, %v2563_v0 }
 0x610   : > { %2803 = vmatprep.mubr.bf16.mxu0 %v2565_v2 }
 0x611   : > { %2804 = vmatmul.mubr.bf16.vlgmr.msra.gmra.mrb[80].mxu0 %v2564_v4 }
 0x6e4   : > { %v2805_v9 = vpop.f32.mrb[80].mxu0 }
 0x6e5   : > { %v2806_v10 = vadd.f32 %v2805_v9, %v2604_v7  ;;  %v2807_v11 = vpop.f32.mrb[81].mxu0 }
 0x6e6   : > { %v2808_v12 = vadd.f32 %v2807_v11, %v2608_v8  ;;  %v2809_v13 = vpop.f32.mrb[82].mxu0 }
 0x6e7   : > { %v2812_v14 = vmul.f32 0.01, %v2806_v10  ;;  %v2810_v15 = vpop.f32.mrb[83].mxu0 }
 0x6e8   : > { %v2813_v16 = vmul.f32 0.01, %v2808_v12 }
 0x6e9   : > { %v2814_v37 = vmax.f32 %v2806_v10, %v2812_v14 }
 0x6ea   : > { %v2815_v39 = vmax.f32 %v2808_v12, %v2813_v16 }
 0x6eb   : > { %v2816_v18 = vpack.c.bf16 %v2814_v37, %v2814_v37 }
 0x6ec   : > { %v2817_v17 = vpack.c.bf16 %v2815_v39, %v2815_v39 }
 0x6ee   : > { %3055 = vmatprep.mubr.bf16.mxu1 %v2817_v17 }
 0x6ef   : > { %3056 = vmatmul.mubr.bf16.vlgmr.msra.gmra.mrb[68].mxu1 %v2816_v18 }
 0x7c2   : > { %v3057_v27 = vpop.f32.mrb[68].mxu1 }
 0x7c3   : > { %v3058_v28 = vadd.f32 %v3057_v27, %v2856_v20  ;;  %v3059_v29 = vpop.f32.mrb[69].mxu1 }
 0x7c4   : > { %v3060_v32 = vadd.f32 %v3059_v29, %v2860_v23  ;;  %v3061_v30 = vpop.f32.mrb[70].mxu1 }
 0x7c5   : > { %3064 = vst [vmem:[%s441_s15] sm:$0xff] %v3058_v28  ;;  %v3062_v57 = vpop.f32.mrb[71].mxu1 }
 0x7c6   : > { %3065 = vst [vmem:[%s441_s15 + $0x8] sm:$0xff] %v3060_v32 }
 0x7c7   : > { %3998 = shalt.err (!%p3995_p0)
}
 0x7c8   : > { %s3999_s25 = scalar_lea.hbm %s4732_s13, 256  ;;  %s4003_s16 = scalar_lea.hbm %s4815_s29, 512 }
 0x7c9   : > { %p4000_p10 = scmp.ne.s32.totalorder %s4732_s13, %s3999_s25  ;;  %p4004_p4 = scmp.lt.u32.totalorder %s4732_s13, %s4815_s29 }
 0x7ca   : > { %p4005_p12 = scmp.lt.u32.totalorder %s4003_s16, %s3999_s25  ;;  %p4007_p8 = scmp.lt.u32.totalorder %s3999_s25, %s4732_s13 }
 0x7cb   : > { %p4001_p2 = pnand %p4000_p10, %p4816_p11 }
 0x7cc   : > { %p4006_p7 = por %p4005_p12, %p4004_p4 }
 0x7cd   : > { %p4002_p3 = pneg %p4001_p2 }
 0x7ce   : > { %p4008_p13 = por %p4007_p8, %p4006_p7 }
 0x7d0   : > { %p4009_p1 = pnand %p4008_p13, %p4002_p3 }
 0x7d2   : > { %4012 = shalt.err (!%p4009_p1)
}
 0x7d3   : > { %3480 = dma.vmem_to_hbm [thread:$0]  (%p4816_p11), %s4734_s11, 256, %s4732_s13, %s3067_s21  }
 0x7d4 PF: > { %s4817_s22 = sld [smem:[#allocation17_spill]]  ;;  %s4818_s15 = sld [smem:[#allocation15_spill]] }
 0x7d5   : > { %s4819_s26 = sld [smem:[#allocation20_spill]] }
 0x7da   : > { %p3507_p6 = scmp.ge.s32.totalorder %s4817_s22, 2  ;;  %s3093_s23 = sand.u32 1, %s4818_s15  }
 0x7db   : > { %p4820_p9 = scmp.ne.s32.totalorder %s4819_s26, 0  ;;  %s3094_s24 = scalar_lea.sflag [#allocation4], %s3093_s23 }
 0x7dd   : > { %p3496_p5 = pnand %p3507_p6, %p4820_p9 }
 0x7df   : > { %4042 = dma.done.wait (!%p3496_p5), %s3094_s24, 256  }
 0x7e0   : > { %4044 = vsyncadd (!%p3496_p5), %s3094_s24, 4294967040  ;;  %s4821_s20 = sld [smem:[#allocation18_spill]]  ;;  %s4822_s28 = sld [smem:[#allocation16_spill]] }
 0x7e1   : > { %s4823_s19 = sld [smem:[#allocation19_spill]]  ;;  %s4824_s17 = smov %s4051_s18 }
 0x7e6   : > { %p24_p0 = scmp.ge.s32.totalorder %s4821_s20, 4   ;;  %s4825_s18 = smov %s4822_s28 }
 0x7e8   :  { %26 = sbr.rel (!%p24_p0) target bundleno = 8 (0x8), region = 118 }
 0x7ef   :  { %3099 = vsyncpa [#allocation3], 1 }
 0x7f0   :  { %3101 = vsyncpa [#allocation3 + $0x1], 1 }
 0x7f1   :  { %3102 = vsyncpa [#allocation6], 1 }
 0x7f2   :  { %3103 = vsyncpa [#allocation9], 1 }
 0x7f3   :  { %3104 = vsyncpa [#allocation4], 1 }
 0x7f4   :  { %3106 = vsyncpa [#allocation4 + $0x1], 1 }

</bundles_post_ra>
